<compile_context>
chip_gen: v5e
topology: v5e:2x2
jax: 0.10.0
libtpu: 0.0.40
codegen_flags: <defaults>
</compile_context>

<pallas_src>
import functools

import numpy as np

import jax
import jax.numpy as jnp
from jax import lax
from jax.experimental import pallas as pl
from jax.experimental.pallas import tpu as pltpu

_MIB = 1024 * 1024


def _round_up(n, m):
    return ((n + m - 1) // m) * m


def _vmem_capacity_bytes():
    """Physical VMEM of the attached TPU; conservative 64 MiB (v7x) fallback."""
    try:
        return int(pltpu.get_tpu_info().vmem_capacity_bytes)
    except Exception:
        return 64 * _MIB


# ----------------------------- kernel 1: p_conv --------------------------------
def _offset_conv_kernel(xp_ref, w_ref, b_ref, out_ref, *, ho, wo, cin):
    """3x3 conv (input pre-padded by 1), stride 1, bias, f32 (positions stay
    full precision so the bilinear weights match the reference).

    xp_ref : (1, ho+2, wo+2, cin)
    w_ref  : (9*cin, co)   im2col weight, row index = (a*3 + t)*cin + c
    b_ref  : (1, co)
    out_ref: (1, ho*wo, co)  flat-spatial output (wrapper reshape is free)
    """
    co = w_ref.shape[1]
    acc = jnp.zeros((ho * wo, co), jnp.float32)
    # Partial im2col: per row shift `a`, concatenate the 3 column shifts along
    # channels -> one K = 3*cin matmul (3 MXU passes instead of 9 skinny ones).
    for a in range(3):
        chunk = jnp.concatenate(
            [xp_ref[0, a:a + ho, t:t + wo, :] for t in range(3)], axis=2)
        chunk = chunk.reshape(ho * wo, 3 * cin).astype(jnp.float32)
        w_a = w_ref[a * 3 * cin:(a * 3 + 3) * cin, :].astype(jnp.float32)
        acc = acc + jnp.dot(chunk, w_a, preferred_element_type=jnp.float32)
    acc = acc + b_ref[...].astype(jnp.float32)
    out_ref[0] = acc.astype(out_ref.dtype)


def _p_conv(x_nhwc, pw, pb, vmem_cap):
    """offset = p_conv(x): full-resolution 3x3 / pad-1 conv, grid over batch."""
    B, H, W, C = x_nhwc.shape
    co = pw.shape[0]
    xp1 = jnp.pad(x_nhwc, ((0, 0), (1, 1), (1, 1), (0, 0)))
    w_off = jnp.transpose(pw, (2, 3, 1, 0)).reshape(9 * C, co)
    b_off = pb.reshape(1, co)

    # VMEM budget derived from the actual (lane/sublane padded) block sizes.
    in_block = (H + 2) * _round_up(W + 2, 8) * _round_up(C, 128) * 4
    out_block = _round_up(H * W, 8) * _round_up(co, 128) * 4
    w_block = _round_up(9 * C, 8) * _round_up(co, 128) * 4
    temps = 2 * _round_up(H * W, 8) * _round_up(3 * C, 128) * 4
    est = 2 * (in_block + out_block) + w_block + temps
    vmem_limit = int(min(0.85 * vmem_cap, max(32 * _MIB, est + 8 * _MIB)))

    # TODO(synk): row-tile this conv with a 2-row halo for very large feature
    # maps; a single padded image per grid step is fine at detection-head sizes.
    return pl.pallas_call(
        functools.partial(_offset_conv_kernel, ho=H, wo=W, cin=C),
        grid=(B,),
        in_specs=[
            pl.BlockSpec((1, H + 2, W + 2, C), lambda b: (b, 0, 0, 0)),
            pl.BlockSpec((9 * C, co), lambda b: (0, 0)),
            pl.BlockSpec((1, co), lambda b: (0, 0)),
        ],
        out_specs=pl.BlockSpec((1, H * W, co), lambda b: (b, 0, 0)),
        out_shape=jax.ShapeDtypeStruct((B, H * W, co), jnp.float32),
        compiler_params=pltpu.CompilerParams(
            dimension_semantics=("parallel",),
            vmem_limit_bytes=vmem_limit),
    )(xp1, w_off, b_off)


# --------------- kernel 2: deformable sampling + ks x ks conv ------------------
def _deform_sample_conv_kernel(xflat_ref, p_ref, w2_ref, o_ref, acc_ref, *, hp, wp):
    """One (batch, row-tile, kernel-sample) grid step.

    xflat_ref: (1, hp*wp, C) bf16   zero-padded image, flat rows r*wp + c
                                    (block index invariant over inner grid axes)
    p_ref    : (1, 1, T, 2)  f32    sampling positions (x=row, y=col), sample n
    w2_ref   : (1, C, Cout)  bf16   conv weight slice of sample n
    o_ref    : (1, T, Cout)
    acc_ref  : (T, Cout)     f32    accumulator scratch
    """
    n = pl.program_id(2)

    @pl.when(n == 0)
    def _():
        acc_ref[...] = jnp.zeros_like(acc_ref)

    l_flat = hp * wp
    px = p_ref[0, 0, :, 0:1]                                   # (T, 1)
    py = p_ref[0, 0, :, 1:2]

    fx = jnp.floor(px)
    fy = jnp.floor(py)
    q_ltx = jnp.clip(fx, 0.0, hp - 1.0)
    q_rbx = jnp.clip(fx + 1.0, 0.0, hp - 1.0)
    q_lty = jnp.clip(fy, 0.0, wp - 1.0)
    q_rby = jnp.clip(fy + 1.0, 0.0, wp - 1.0)
    pcx = jnp.clip(px, 0.0, hp - 1.0)
    pcy = jnp.clip(py, 0.0, wp - 1.0)

    ax_lt = 1.0 + (q_ltx - pcx)
    ax_rb = 1.0 - (q_rbx - pcx)
    ay_lt = 1.0 + (q_lty - pcy)
    ay_rb = 1.0 - (q_rby - pcy)

    # Row / column index of every flat padded-image position, built on the VPU
    # (no DMA'd index table).  Exact for integers < 2^24.
    m = lax.broadcasted_iota(jnp.int32, (1, l_flat), 1).astype(jnp.float32)
    rr = jnp.floor((m + 0.5) * (1.0 / wp))                     # m // wp
    cc = m - rr * wp                                           # m %  wp

    # Soft one-hot selection; the row/col factors multiply out to exactly the
    # reference's 4 clamped bilinear corner weights (duplicated corners sum).
    sel_r = (jnp.where(rr == q_ltx, ax_lt, 0.0)
             + jnp.where(rr == q_rbx, ax_rb, 0.0))             # (T, L)
    sel_c = (jnp.where(cc == q_lty, ay_lt, 0.0)
             + jnp.where(cc == q_rby, ay_rb, 0.0))             # (T, L)
    smat = (sel_r * sel_c).astype(jnp.bfloat16)                # (T, L)

    # Bilinear gather of all channels for sample n -> bf16 MXU matmul, f32 acc.
    x_n = jnp.dot(smat, xflat_ref[0], preferred_element_type=jnp.float32)
    # Contribution of sample n to the ks x ks conv -> bf16 MXU matmul.
    acc_ref[...] += jnp.dot(x_n.astype(jnp.bfloat16), w2_ref[0],
                            preferred_element_type=jnp.float32)

    @pl.when(n == pl.num_programs(2) - 1)
    def _():
        o_ref[0] = acc_ref[...].astype(o_ref.dtype)


def _kernel2_vmem_bytes(t_rows, l_flat, c, c_out, single_buffer_x):
    """Rough per-grid-step VMEM footprint (padded to hardware tiles); used to
    pick the row tile and vmem_limit_bytes."""
    t_pad = _round_up(t_rows, 8)
    l_lane = _round_up(l_flat, 128)
    x_block = _round_up(l_flat, 16) * _round_up(c, 128) * 2           # bf16
    p_block = t_pad * 128 * 4
    w_block = _round_up(c, 16) * _round_up(c_out, 128) * 2
    o_block = t_pad * _round_up(c_out, 128) * 4
    acc = t_pad * _round_up(c_out, 128) * 4
    temps = t_pad * l_lane * (5 * 4 + 2)        # sel_r/sel_c/where f32 + bf16 smat
    n_x = 1 if single_buffer_x else 2
    return n_x * x_block + 2 * (p_block + w_block + o_block) + acc + temps


# --------------------------------- wrapper -------------------------------------
def deform_conv_forward(x_nchw, params, *, kernel_size=3, padding=1, stride=1,
                        modulation=False, target_rows=256):
    """Forward pass of DeformConv.  params = (p_conv_w, p_conv_b, conv_w) in
    PyTorch layouts: (2N, Cin, 3, 3), (2N,), (Cout, Cin, ks, ks)."""
    if modulation:
        # TODO(synk): modulation (Deformable ConvNets v2 m_conv branch) not
        # implemented; the module default is modulation=False.
        raise NotImplementedError("modulation=True not supported")

    pw, pb, cw = params
    B, C, H, W = x_nchw.shape
    ks = kernel_size
    N = ks * ks
    c_out = cw.shape[0]
    vmem_cap = _vmem_capacity_bytes()

    x = jnp.transpose(x_nchw, (0, 2, 3, 1))                    # NHWC

    # ---------------- offset = p_conv(x): 3x3 conv, padding 1 ------------------
    off_flat = _p_conv(x, pw, pb, vmem_cap)                    # (B, H*W, 2N) f32
    off = off_flat.reshape(B, H, W, 2 * N)
    if stride > 1:
        # TODO(synk): compute the strided p_conv output directly instead of
        # subsampling the stride-1 result.
        off = off[:, ::stride, ::stride, :]
    ho, wo = off.shape[1], off.shape[2]
    t_total = ho * wo
    off = off.reshape(B, t_total, 2 * N)

    # Static sampling-grid base p_0 + p_n (tiny numpy tables, built once).
    rng = np.arange(-(ks - 1) // 2, (ks - 1) // 2 + 1, dtype=np.float32)
    pn_x = np.repeat(rng, ks)                 # sample n = a*ks + t -> rng[a]
    pn_y = np.tile(rng, ks)                   #                      -> rng[t]
    ii, jj = np.meshgrid(np.arange(ho), np.arange(wo), indexing="ij")
    base_x = (ii.reshape(-1, 1) * stride + 1).astype(np.float32) + pn_x[None, :]
    base_y = (jj.reshape(-1, 1) * stride + 1).astype(np.float32) + pn_y[None, :]

    # p = p_0 + p_n + offset, laid out per sample as (B, N, T, 2) so the sample
    # grid axis selects its (T, 2) block directly from the index_map.
    px_all = off[:, :, :N] + jnp.asarray(base_x)[None]         # (B, T, N)
    py_all = off[:, :, N:] + jnp.asarray(base_y)[None]
    p_bnt2 = jnp.transpose(jnp.stack([px_all, py_all], axis=-1), (0, 2, 1, 3))

    # ------------- padded input / weights for the fused sampling conv ----------
    if padding:
        xpd = jnp.pad(x, ((0, 0), (padding, padding), (padding, padding), (0, 0)))
    else:
        xpd = x
    hp, wp = xpd.shape[1], xpd.shape[2]
    l_flat = hp * wp
    xflat = xpd.reshape(B, l_flat, C).astype(jnp.bfloat16)     # bf16 MXU operand
    # conv weight per sample: w2[n, c, o] = cw[o, c, n // ks, n % ks]
    w2 = jnp.transpose(cw, (2, 3, 1, 0)).reshape(N, C, c_out).astype(jnp.bfloat16)

    # ------------------------- tile / VMEM budgeting ---------------------------
    budget = int(0.55 * vmem_cap)
    valid = [th for th in range(1, ho + 1)
             if ho % th == 0 and (th == ho or (th * wo) % 8 == 0)]
    fitting = [th for th in valid
               if _kernel2_vmem_bytes(th * wo, l_flat, C, c_out, True) <= budget]
    pool = fitting or valid
    under = [th for th in pool if th * wo <= max(target_rows, wo)]
    th = max(under) if under else min(pool)
    t_rows = th * wo
    n_tiles = ho // th

    flops = 2 * B * t_total * N * (l_flat * C + C * c_out)
    bytes_accessed = (B * (l_flat * C * 2 + N * t_total * 2 * 4 + t_total * c_out * 4)
                      + N * C * c_out * 2)

    def call_sample_conv(single_buffer_x):
        x_kwargs = {"pipeline_mode": pl.Buffered(1)} if single_buffer_x else {}
        est = _kernel2_vmem_bytes(t_rows, l_flat, C, c_out, single_buffer_x)
        vmem_limit = int(min(0.85 * vmem_cap, max(32 * _MIB, est + 8 * _MIB)))
        return pl.pallas_call(
            functools.partial(_deform_sample_conv_kernel, hp=hp, wp=wp),
            grid=(B, n_tiles, N),
            in_specs=[
                # padded image block is invariant over (row-tile, sample) axes
                pl.BlockSpec((1, l_flat, C), lambda b, i, n: (b, 0, 0), **x_kwargs),
                pl.BlockSpec((1, 1, t_rows, 2), lambda b, i, n: (b, n, i, 0)),
                pl.BlockSpec((1, C, c_out), lambda b, i, n: (n, 0, 0)),
            ],
            out_specs=pl.BlockSpec((1, t_rows, c_out), lambda b, i, n: (b, i, 0)),
            out_shape=jax.ShapeDtypeStruct((B, t_total, c_out), x.dtype),
            scratch_shapes=[pltpu.VMEM((t_rows, c_out), jnp.float32)],
            compiler_params=pltpu.CompilerParams(
                dimension_semantics=("parallel", "parallel", "arbitrary"),
                vmem_limit_bytes=vmem_limit),
            cost_estimate=pl.CostEstimate(flops=int(flops), transcendentals=0,
                                          bytes_accessed=int(bytes_accessed)),
        )(xflat, p_bnt2, w2)

    try:
        # xflat is the dominant VMEM consumer and its block never changes over
        # the inner grid axes -> single-buffer it.
        out3 = jax.block_until_ready(call_sample_conv(True))
    except Exception:
        # Fallback: default double buffering if pl.Buffered(1) is unavailable.
        out3 = call_sample_conv(False)

    out = out3.reshape(B, ho, wo, c_out)
    return jnp.transpose(out, (0, 3, 1, 2))                    # NCHW


# --------------------------- pure-JAX reference ---------------------------------
def deform_conv_reference(x_nchw, params, *, kernel_size=3, padding=1, stride=1):
    """Line-by-line translation of the PyTorch DeformConv.forward."""
    pw, pb, cw = params
    B, C, H, W = x_nchw.shape
    ks = kernel_size
    N = ks * ks
    hi = jax.lax.Precision.HIGHEST

    offset = jax.lax.conv_general_dilated(
        x_nchw, pw, window_strides=(stride, stride), padding=[(1, 1), (1, 1)],
        dimension_numbers=("NCHW", "OIHW", "NCHW"), precision=hi)
    offset = offset + pb.reshape(1, 2 * N, 1, 1)

    if padding:
        xp = jnp.pad(x_nchw, ((0, 0), (0, 0), (padding, padding), (padding, padding)))
    else:
        xp = x_nchw
    Hp, Wp = xp.shape[2], xp.shape[3]
    h, w = offset.shape[2], offset.shape[3]

    rng = jnp.arange(-(ks - 1) // 2, (ks - 1) // 2 + 1, dtype=jnp.float32)
    pnx, pny = jnp.meshgrid(rng, rng, indexing="ij")
    p_n = jnp.concatenate([pnx.reshape(-1), pny.reshape(-1)]).reshape(1, 2 * N, 1, 1)
    i0 = jnp.arange(1, h * stride + 1, stride, dtype=jnp.float32)
    j0 = jnp.arange(1, w * stride + 1, stride, dtype=jnp.float32)
    p0x, p0y = jnp.meshgrid(i0, j0, indexing="ij")
    p_0 = jnp.concatenate([jnp.tile(p0x[None], (N, 1, 1)),
                           jnp.tile(p0y[None], (N, 1, 1))], axis=0)[None]
    p = p_0 + p_n + offset
    p = jnp.transpose(p, (0, 2, 3, 1))                         # (B, h, w, 2N)

    q_lt = jnp.floor(p)
    q_rb = q_lt + 1
    q_ltx = jnp.clip(q_lt[..., :N], 0, Hp - 1)
    q_lty = jnp.clip(q_lt[..., N:], 0, Wp - 1)
    q_rbx = jnp.clip(q_rb[..., :N], 0, Hp - 1)
    q_rby = jnp.clip(q_rb[..., N:], 0, Wp - 1)
    pcx = jnp.clip(p[..., :N], 0, Hp - 1)
    pcy = jnp.clip(p[..., N:], 0, Wp - 1)

    g_lt = (1 + (q_ltx - pcx)) * (1 + (q_lty - pcy))
    g_rb = (1 - (q_rbx - pcx)) * (1 - (q_rby - pcy))
    g_lb = (1 + (q_ltx - pcx)) * (1 - (q_rby - pcy))
    g_rt = (1 - (q_rbx - pcx)) * (1 + (q_lty - pcy))

    xflat = xp.reshape(B, C, Hp * Wp)

    def gather(qx, qy):
        idx = (qx * Wp + qy).astype(jnp.int32)
        idx = jnp.broadcast_to(idx[:, None], (B, C, h, w, N)).reshape(B, C, -1)
        vals = jnp.take_along_axis(xflat, idx, axis=-1)
        return vals.reshape(B, C, h, w, N)

    x_lt = gather(q_ltx, q_lty)
    x_rb = gather(q_rbx, q_rby)
    x_lb = gather(q_ltx, q_rby)
    x_rt = gather(q_rbx, q_lty)

    x_off = (g_lt[:, None] * x_lt + g_rb[:, None] * x_rb
             + g_lb[:, None] * x_lb + g_rt[:, None] * x_rt)     # (B, C, h, w, N)

    # _reshape_x_offset + conv(kernel ks, stride ks, no bias)
    x_off = x_off.reshape(B, C, h, w, ks, ks)
    x_off = jnp.transpose(x_off, (0, 1, 2, 4, 3, 5)).reshape(B, C, h * ks, w * ks)
    out = jax.lax.conv_general_dilated(
        x_off, cw, window_strides=(ks, ks), padding=[(0, 0), (0, 0)],
        dimension_numbers=("NCHW", "OIHW", "NCHW"), precision=hi)
    return out


if __name__ == "__main__":
    key = jax.random.PRNGKey(0)
    kx, kpw, kpb, kcw = jax.random.split(key, 4)

    # small, non-square test so row/col (x/y) mixups would be caught
    B, Cin, Cout, H, W = 2, 4, 8, 16, 12
    ks, padding, stride = 3, 1, 1
    N = ks * ks

    x = jax.random.normal(kx, (B, Cin, H, W), jnp.float32)
    # p_conv: torch layout (2N, Cin, 3, 3) weight and (2N,) bias.  The module
    # zero-initializes this weight; small random weights exercise the same math.
    pw = 0.3 * jax.random.normal(kpw, (2 * N, Cin, 3, 3), jnp.float32)
    pb = 0.5 * jax.random.normal(kpb, (2 * N,), jnp.float32)
    # main conv: torch layout (Cout, Cin, ks, ks); module passes bias=None.
    cw = 0.3 * jax.random.normal(kcw, (Cout, Cin, ks, ks), jnp.float32)
    params = (pw, pb, cw)

    out = deform_conv_forward(x, params, kernel_size=ks, padding=padding,
                              stride=stride)
    out = jax.block_until_ready(out)

    ref = deform_conv_reference(x, params, kernel_size=ks, padding=padding,
                                stride=stride)
    assert out.shape == ref.shape == (B, Cout, H, W), (out.shape, ref.shape)
    # Tolerance covers bf16 MXU operands in the sampling/conv kernel (~8
    # mantissa bits on gathered activations + weights) versus the f32
    # HIGHEST-precision XLA reference; genuine indexing/weight bugs give O(1).
    assert jnp.allclose(out, ref, atol=8e-2, rtol=8e-2), \
        float(jnp.max(jnp.abs(out - ref)))
    print("KERNEL_OK")
</pallas_src>

<mosaic_0001>
module attributes {stable_mosaic.version = 11 : i64} {
  func.func @_offset_conv_kernel(%arg0: i32, %arg1: memref<1x18x14x4xf32, #tpu.memory_space<vmem>>, %arg2: memref<36x18xf32, #tpu.memory_space<vmem>>, %arg3: memref<1x18xf32, #tpu.memory_space<vmem>>, %arg4: memref<1x192x18xf32, #tpu.memory_space<vmem>>) attributes {dimension_semantics = [#tpu.dimension_semantics<parallel>], iteration_bounds = array<i64: 2>, scalar_prefetch = 0 : i64, scratch_operands = 0 : i64, tpu.core_type = #tpu.core_type<tc>, window_params = [{transform_indices = @transform_0, window_bounds = array<i64: 1, 18, 14, 4>}, {pipeline_mode = #tpu.pipeline_mode<synchronous>, transform_indices = @transform_1, window_bounds = array<i64: 36, 18>}, {pipeline_mode = #tpu.pipeline_mode<synchronous>, transform_indices = @transform_2, window_bounds = array<i64: 1, 18>}, {transform_indices = @transform_3, window_bounds = array<i64: 1, 192, 18>}]} {
    %cst = arith.constant 0.000000e+00 : f32
    %0 = vector.broadcast %cst : f32 to vector<192x18xf32>
    %c0 = arith.constant 0 : index
    %c0_0 = arith.constant 0 : index
    %c0_1 = arith.constant 0 : index
    %c0_2 = arith.constant 0 : index
    %1 = vector.load %arg1[%c0, %c0_0, %c0_1, %c0_2] : memref<1x18x14x4xf32, #tpu.memory_space<vmem>>, vector<1x16x12x4xf32>
    %2 = vector.shape_cast %1 : vector<1x16x12x4xf32> to vector<16x12x4xf32>
    %c0_3 = arith.constant 0 : index
    %c0_4 = arith.constant 0 : index
    %c1 = arith.constant 1 : index
    %c0_5 = arith.constant 0 : index
    %3 = vector.load %arg1[%c0_3, %c0_4, %c1, %c0_5] : memref<1x18x14x4xf32, #tpu.memory_space<vmem>>, vector<1x16x12x4xf32>
    %4 = vector.shape_cast %3 : vector<1x16x12x4xf32> to vector<16x12x4xf32>
    %c0_6 = arith.constant 0 : index
    %c0_7 = arith.constant 0 : index
    %c2 = arith.constant 2 : index
    %c0_8 = arith.constant 0 : index
    %5 = vector.load %arg1[%c0_6, %c0_7, %c2, %c0_8] : memref<1x18x14x4xf32, #tpu.memory_space<vmem>>, vector<1x16x12x4xf32>
    %6 = vector.shape_cast %5 : vector<1x16x12x4xf32> to vector<16x12x4xf32>
    %7 = tpu.concatenate %2, %4, %6 in 2 : vector<16x12x4xf32>, vector<16x12x4xf32>, vector<16x12x4xf32> -> vector<16x12x12xf32>
    %8 = vector.shape_cast %7 : vector<16x12x12xf32> to vector<192x12xf32>
    %c0_9 = arith.constant 0 : index
    %c0_10 = arith.constant 0 : index
    %9 = vector.load %arg2[%c0_9, %c0_10] : memref<36x18xf32, #tpu.memory_space<vmem>>, vector<12x18xf32>
    %cst_11 = arith.constant dense<0.000000e+00> : vector<192x18xf32>
    %10 = tpu.matmul %8, %9, %cst_11 {dimension_numbers = #tpu.dot_dimension_numbers<[1], [0], [0], [1], [0, 0, 1, 1], [], []>} : vector<192x12xf32>, vector<12x18xf32>, vector<192x18xf32> -> vector<192x18xf32>
    %11 = arith.addf %0, %10 : vector<192x18xf32>
    %c0_12 = arith.constant 0 : index
    %c1_13 = arith.constant 1 : index
    %c0_14 = arith.constant 0 : index
    %c0_15 = arith.constant 0 : index
    %12 = vector.load %arg1[%c0_12, %c1_13, %c0_14, %c0_15] : memref<1x18x14x4xf32, #tpu.memory_space<vmem>>, vector<1x16x12x4xf32>
    %13 = vector.shape_cast %12 : vector<1x16x12x4xf32> to vector<16x12x4xf32>
    %c0_16 = arith.constant 0 : index
    %c1_17 = arith.constant 1 : index
    %c1_18 = arith.constant 1 : index
    %c0_19 = arith.constant 0 : index
    %14 = vector.load %arg1[%c0_16, %c1_17, %c1_18, %c0_19] : memref<1x18x14x4xf32, #tpu.memory_space<vmem>>, vector<1x16x12x4xf32>
    %15 = vector.shape_cast %14 : vector<1x16x12x4xf32> to vector<16x12x4xf32>
    %c0_20 = arith.constant 0 : index
    %c1_21 = arith.constant 1 : index
    %c2_22 = arith.constant 2 : index
    %c0_23 = arith.constant 0 : index
    %16 = vector.load %arg1[%c0_20, %c1_21, %c2_22, %c0_23] : memref<1x18x14x4xf32, #tpu.memory_space<vmem>>, vector<1x16x12x4xf32>
    %17 = vector.shape_cast %16 : vector<1x16x12x4xf32> to vector<16x12x4xf32>
    %18 = tpu.concatenate %13, %15, %17 in 2 : vector<16x12x4xf32>, vector<16x12x4xf32>, vector<16x12x4xf32> -> vector<16x12x12xf32>
    %19 = vector.shape_cast %18 : vector<16x12x12xf32> to vector<192x12xf32>
    %c12 = arith.constant 12 : index
    %c0_24 = arith.constant 0 : index
    %20 = vector.load %arg2[%c12, %c0_24] : memref<36x18xf32, #tpu.memory_space<vmem>>, vector<12x18xf32>
    %cst_25 = arith.constant dense<0.000000e+00> : vector<192x18xf32>
    %21 = tpu.matmul %19, %20, %cst_25 {dimension_numbers = #tpu.dot_dimension_numbers<[1], [0], [0], [1], [0, 0, 1, 1], [], []>} : vector<192x12xf32>, vector<12x18xf32>, vector<192x18xf32> -> vector<192x18xf32>
    %22 = arith.addf %11, %21 : vector<192x18xf32>
    %c0_26 = arith.constant 0 : index
    %c2_27 = arith.constant 2 : index
    %c0_28 = arith.constant 0 : index
    %c0_29 = arith.constant 0 : index
    %23 = vector.load %arg1[%c0_26, %c2_27, %c0_28, %c0_29] : memref<1x18x14x4xf32, #tpu.memory_space<vmem>>, vector<1x16x12x4xf32>
    %24 = vector.shape_cast %23 : vector<1x16x12x4xf32> to vector<16x12x4xf32>
    %c0_30 = arith.constant 0 : index
    %c2_31 = arith.constant 2 : index
    %c1_32 = arith.constant 1 : index
    %c0_33 = arith.constant 0 : index
    %25 = vector.load %arg1[%c0_30, %c2_31, %c1_32, %c0_33] : memref<1x18x14x4xf32, #tpu.memory_space<vmem>>, vector<1x16x12x4xf32>
    %26 = vector.shape_cast %25 : vector<1x16x12x4xf32> to vector<16x12x4xf32>
    %c0_34 = arith.constant 0 : index
    %c2_35 = arith.constant 2 : index
    %c2_36 = arith.constant 2 : index
    %c0_37 = arith.constant 0 : index
    %27 = vector.load %arg1[%c0_34, %c2_35, %c2_36, %c0_37] : memref<1x18x14x4xf32, #tpu.memory_space<vmem>>, vector<1x16x12x4xf32>
    %28 = vector.shape_cast %27 : vector<1x16x12x4xf32> to vector<16x12x4xf32>
    %29 = tpu.concatenate %24, %26, %28 in 2 : vector<16x12x4xf32>, vector<16x12x4xf32>, vector<16x12x4xf32> -> vector<16x12x12xf32>
    %30 = vector.shape_cast %29 : vector<16x12x12xf32> to vector<192x12xf32>
    %c24 = arith.constant 24 : index
    %c0_38 = arith.constant 0 : index
    %31 = vector.load %arg2[%c24, %c0_38] : memref<36x18xf32, #tpu.memory_space<vmem>>, vector<12x18xf32>
    %cst_39 = arith.constant dense<0.000000e+00> : vector<192x18xf32>
    %32 = tpu.matmul %30, %31, %cst_39 {dimension_numbers = #tpu.dot_dimension_numbers<[1], [0], [0], [1], [0, 0, 1, 1], [], []>} : vector<192x12xf32>, vector<12x18xf32>, vector<192x18xf32> -> vector<192x18xf32>
    %33 = arith.addf %22, %32 : vector<192x18xf32>
    %c0_40 = arith.constant 0 : index
    %c0_41 = arith.constant 0 : index
    %34 = vector.load %arg3[%c0_40, %c0_41] : memref<1x18xf32, #tpu.memory_space<vmem>>, vector<1x18xf32>
    %35 = vector.broadcast %34 : vector<1x18xf32> to vector<192x18xf32>
    %36 = arith.addf %33, %35 : vector<192x18xf32>
    %c0_42 = arith.constant 0 : index
    %c0_43 = arith.constant 0 : index
    %c0_44 = arith.constant 0 : index
    %37 = vector.load %arg4[%c0_42, %c0_43, %c0_44] : memref<1x192x18xf32, #tpu.memory_space<vmem>>, vector<1x192x18xf32>
    %38 = vector.shape_cast %37 : vector<1x192x18xf32> to vector<192x18xf32>
    %39 = vector.shape_cast %36 : vector<192x18xf32> to vector<1x192x18xf32>
    tpu.vector_store %arg4[%c0_42, %c0_43, %c0_44], %39 {strides = array<i32>} : memref<1x192x18xf32, #tpu.memory_space<vmem>>, vector<1x192x18xf32>,
    return
  }
  func.func @transform_0(%arg0: i32) -> (i32, i32, i32, i32) {
    %c0_i32 = arith.constant 0 : i32
    %c0_i32_0 = arith.constant 0 : i32
    %c0_i32_1 = arith.constant 0 : i32
    %c0_i32_2 = arith.constant 0 : i32
    return %arg0, %c0_i32, %c0_i32_0, %c0_i32_1 : i32, i32, i32, i32
  }
  func.func @transform_1(%arg0: i32) -> (i32, i32) {
    %c0_i32 = arith.constant 0 : i32
    %c0_i32_0 = arith.constant 0 : i32
    %c0_i32_1 = arith.constant 0 : i32
    return %c0_i32, %c0_i32_0 : i32, i32
  }
  func.func @transform_2(%arg0: i32) -> (i32, i32) {
    %c0_i32 = arith.constant 0 : i32
    %c0_i32_0 = arith.constant 0 : i32
    %c0_i32_1 = arith.constant 0 : i32
    return %c0_i32, %c0_i32_0 : i32, i32
  }
  func.func @transform_3(%arg0: i32) -> (i32, i32, i32) {
    %c0_i32 = arith.constant 0 : i32
    %c0_i32_0 = arith.constant 0 : i32
    %c0_i32_1 = arith.constant 0 : i32
    return %arg0, %c0_i32, %c0_i32_0 : i32, i32, i32
  }
}

</mosaic_0001>

<bundles_post_ra>
// kernel: tpu_custom_call.1
= control target key start
LH: loop header
LB: loop body
LE: loop exit
PB: predicated region body
PF: predicated region fallthrough
CT: control target
= control target key end

     0   :  { %s2692_s12 = smov 0   ;;  %s4070_s0 = inlined_call_operand.vmem [shape: f32[2,18,14,4], index: 0, kind: input, shape index: {}]   ;;  %s4071_s1 = inlined_call_operand.vmem [shape: f32[36,18], index: 1, kind: input, shape index: {}]   ;;  %s4072_s2 = inlined_call_operand.vmem [shape: f32[1,18], index: 2, kind: input, shape index: {}]   ;;  %s4073_s3 = inlined_call_operand.vmem [shape: f32[2,192,18], index: 3, kind: output, shape index: {}]  }
   0x1 LB: > { %s2364_s13 = sadd.s32 4294967295, %s2668_s12   ;;  %p2368_p0 = scmp.ge.s32.totalorder %s2668_s12, 1  ;;  %s2668_s12 = sphi %s2692_s12, %s13_s12  }
   0x2   : > { %p137_p1 = scmp.lt.s32.totalorder %s2668_s12, 3 }
   0x4   : > { %p138_p2 = pnand %p2368_p0, %p137_p1 }
   0x6   : > { %141 = sbr.rel (%p138_p2) target bundleno = 792 (0x318), region = 32 }
   0xb   : > { %p161_p3 = scmp.lt.s32.totalorder %s2364_s13, 1  ;;  %s2670_s18 = smov 4   ;;  %vm1234_vm0 = vcmask 1043456   ;;  %vm523_vm1 = vcmask 31744   ;;  %vm556_vm2 = vcmask 64512   ;;  %vm1185_vm3 = vcmask 97280  }
   0xc   : > { %s2671_s19 = smov 8   ;;  %vm2284_vm4 = vcmask 146432  }
   0xd   : > { %s4130_s13 = smov (!%p161_p3, %s2364_s13), 1 }
   0xe   : > { %s2646_s14 = smul.u32 288, %s4130_s13 }
   0xf   : > { %s2647_s5 = smul.u32 192, %s4130_s13 }
  0x10   : > { %s2706_s17 = scalar_lea.vmem %s4070_s0, %s2646_s14 }
  0x11   : > { %v2709_v0 = vld [vmem:[%s2706_s17 + $0x21] sm:$0xff]  ;;  %v2712_v1 = vld [vmem:[%s2706_s17 + $0x11] sm:$0xff]  ;;  %v208_v3 = vld [vmem:[%s2706_s17 + $0x29] sm:$0xf]  ;;  %s3937_s10 = scalar_lea.vmem %s4073_s3, %s2647_s5 }
  0x12   : > { %v203_v2 = vld [vmem:[%s2706_s17 + $0x1] sm:$0xff]  ;;  %307 = vrot.lane.b32.xlu2 %v2709_v0, %s2670_s18  ;;  %303 = vrot.lane.b32.xlu1 %v2712_v1, %s2670_s18  ;;  %v206_v4 = vld [vmem:[%s2706_s17 + $0x19] sm:$0xf] }
  0x13   : > { %299 = vrot.lane.b32.xlu0 %v203_v2, %s2670_s18  ;;  %v204_v5 = vld [vmem:[%s2706_s17 + $0x9] sm:$0xf]  ;;  %v2727_v6 = vld [vmem:[%s2706_s17 + $0x41] sm:$0xff]  ;;  %v210_v7 = vld [vmem:[%s2706_s17 + $0x39] sm:$0xf] }
  0x14   : > { %v2731_v8 = vld [vmem:[%s2706_s17 + $0x31] sm:$0xff]  ;;  %v214_v9 = vld [vmem:[%s2706_s17 + $0x59] sm:$0xf]  ;;  %v212_v11 = vld [vmem:[%s2706_s17 + $0x49] sm:$0xf] }
  0x15   : > { %v2740_v10 = vld [vmem:[%s2706_s17 + $0x51] sm:$0xff]  ;;  %v216_v13 = vld [vmem:[%s2706_s17 + $0x69] sm:$0xf]  ;;  %v2752_v14 = vld [vmem:[%s2706_s17 + $0x61] sm:$0xff] }
  0x16   : > { %v2748_v12 = vld [vmem:[%s2706_s17 + $0x71] sm:$0xff]  ;;  %v220_v15 = vld [vmem:[%s2706_s17 + $0x89] sm:$0xf]  ;;  %v2761_v16 = vld [vmem:[%s2706_s17 + $0x81] sm:$0xff] }
  0x17   : > { %v218_v17 = vld [vmem:[%s2706_s17 + $0x79] sm:$0xf]  ;;  %v2769_v18 = vld [vmem:[%s2706_s17 + $0xa1] sm:$0xff]  ;;  %v2773_v20 = vld [vmem:[%s2706_s17 + $0x91] sm:$0xff] }
  0x18   : > { %v222_v19 = vld [vmem:[%s2706_s17 + $0x99] sm:$0xf]  ;;  %v2782_v22 = vld [vmem:[%s2706_s17 + $0xb1] sm:$0xff]  ;;  %v224_v23 = vld [vmem:[%s2706_s17 + $0xa9] sm:$0xf] }
  0x19   : > { %v226_v21 = vld [vmem:[%s2706_s17 + $0xb9] sm:$0xf]  ;;  %v2790_v24 = vld [vmem:[%s2706_s17 + $0xd1] sm:$0xff]  ;;  %v228_v25 = vld [vmem:[%s2706_s17 + $0xc9] sm:$0xf] }
  0x1a   : > { %309 = vrot.lane.b32.xlu2 %v208_v3, %s2670_s18  ;;  %305 = vrot.lane.b32.xlu1 %v206_v4, %s2670_s18  ;;  %v2794_v26 = vld [vmem:[%s2706_s17 + $0xc1] sm:$0xff]  ;;  %v232_v27 = vld [vmem:[%s2706_s17 + $0xe9] sm:$0xf] }
  0x1b   : > { %301 = vrot.lane.b32.xlu0 %v204_v5, %s2670_s18  ;;  %v2803_v28 = vld [vmem:[%s2706_s17 + $0xe1] sm:$0xff]  ;;  %v230_v29 = vld [vmem:[%s2706_s17 + $0xd9] sm:$0xf]  ;;  %v2813_v32 = vld [vmem:[%s2706_s17 + $0xf1] sm:$0xff] }
  0x1c   : > { %v235_v30 = vld [vmem:[%s2706_s17 + $0x2] sm:$0xff]  ;;  %v234_v31 = vld [vmem:[%s2706_s17 + $0xf9] sm:$0xf]  ;;  %v236_v35 = vld [vmem:[%s2706_s17 + $0xa] sm:$0xf] }
  0x1d   : > { %v238_v33 = vld [vmem:[%s2706_s17 + $0x1a] sm:$0xf]  ;;  %v237_v34 = vld [vmem:[%s2706_s17 + $0x12] sm:$0xff]  ;;  %v240_v38 = vld [vmem:[%s2706_s17 + $0x2a] sm:$0xf] }
  0x1e   : > { %v2828_v37 = vld [vmem:[%s2706_s17 + $0x32] sm:$0xff]  ;;  %v2832_v39 = vld [vmem:[%s2706_s17 + $0x22] sm:$0xff]  ;;  %v244_v41 = vld [vmem:[%s2706_s17 + $0x4a] sm:$0xf] }
  0x1f   : > { %v2843_v42 = vld [vmem:[%s2706_s17 + $0x42] sm:$0xff]  ;;  %v242_v43 = vld [vmem:[%s2706_s17 + $0x3a] sm:$0xf]  ;;  %v2855_v47 = vld [vmem:[%s2706_s17 + $0x52] sm:$0xff] }
  0x20   : > { %v247_v45 = vld [vmem:[%s2706_s17 + $0x62] sm:$0xff]  ;;  %v246_v46 = vld [vmem:[%s2706_s17 + $0x5a] sm:$0xf]  ;;  %v2869_v52 = vld [vmem:[%s2706_s17 + $0x72] sm:$0xff] }
  0x21   : > { %v250_v51 = vld [vmem:[%s2706_s17 + $0x7a] sm:$0xf]  ;;  %v248_v53 = vld [vmem:[%s2706_s17 + $0x6a] sm:$0xf]  ;;  %v2883_v57 = vld [vmem:[%s2706_s17 + $0x92] sm:$0xff] }
  0x22   : > { %315 = vrot.lane.b32.xlu2 %v2727_v6, %s2670_s18  ;;  %313 = vrot.lane.b32.xlu1 %v210_v7, %s2670_s18  ;;  %v252_v58 = vld [vmem:[%s2706_s17 + $0x8a] sm:$0xf]  ;;  %v2887_v59 = vld [vmem:[%s2706_s17 + $0x82] sm:$0xff] }
  0x23   : > { %311 = vrot.lane.b32.xlu0 %v2731_v8, %s2670_s18  ;;  %v2901_v63 = vld [vmem:[%s2706_s17 + $0xa2] sm:$0xff]  ;;  %v254_v2 = vld [vmem:[%s2706_s17 + $0x9a] sm:$0xf] }
  0x24   : > { %v2404_v7 = vld [vmem:[%s2706_s17 + $0x19] sm:$0xf] }
  0x2a   : > { %321 = vrot.lane.b32.xlu2 %v214_v9, %s2670_s18  ;;  %319 = vrot.lane.b32.xlu1 %v2740_v10, %s2670_s18  ;;  %v256_v9 = vld [vmem:[%s2706_s17 + $0xaa] sm:$0xf] }
  0x2b   : > { %317 = vrot.lane.b32.xlu0 %v212_v11, %s2670_s18 }
  0x32   : > { %327 = vrot.lane.b32.xlu2 %v2748_v12, %s2670_s18  ;;  %325 = vrot.lane.b32.xlu1 %v216_v13, %s2670_s18 }
  0x33   : > { %323 = vrot.lane.b32.xlu0 %v2752_v14, %s2670_s18 }
  0x3a   : > { %333 = vrot.lane.b32.xlu2 %v220_v15, %s2670_s18  ;;  %331 = vrot.lane.b32.xlu1 %v2761_v16, %s2670_s18  ;;  %v2408_v15 = vld [vmem:[%s2706_s17 + $0x39] sm:$0xf] }
  0x3b   : > { %329 = vrot.lane.b32.xlu0 %v218_v17, %s2670_s18 }
  0x42   : > { %339 = vrot.lane.b32.xlu2 %v2769_v18, %s2670_s18  ;;  %337 = vrot.lane.b32.xlu1 %v222_v19, %s2670_s18 }
  0x43   : > { %335 = vrot.lane.b32.xlu0 %v2773_v20, %s2670_s18 }
  0x4a   : > { %345 = vrot.lane.b32.xlu2 %v226_v21, %s2670_s18  ;;  %343 = vrot.lane.b32.xlu1 %v2782_v22, %s2670_s18 }
  0x4b   : > { %341 = vrot.lane.b32.xlu0 %v224_v23, %s2670_s18  ;;  %v2440_v23 = vld [vmem:[%s2706_s17 + $0x3a] sm:$0xf] }
  0x52   : > { %351 = vrot.lane.b32.xlu2 %v2790_v24, %s2670_s18  ;;  %349 = vrot.lane.b32.xlu1 %v228_v25, %s2670_s18  ;;  %v2436_v25 = vld [vmem:[%s2706_s17 + $0x1a] sm:$0xf] }
  0x53   : > { %347 = vrot.lane.b32.xlu0 %v2794_v26, %s2670_s18 }
  0x5a   : > { %357 = vrot.lane.b32.xlu2 %v232_v27, %s2670_s18  ;;  %355 = vrot.lane.b32.xlu1 %v2803_v28, %s2670_s18 }
  0x5b   : > { %353 = vrot.lane.b32.xlu0 %v230_v29, %s2670_s18 }
  0x62   : > { %427 = vrot.lane.b32.xlu2 %v235_v30, %s2671_s19  ;;  %361 = vrot.lane.b32.xlu1 %v234_v31, %s2670_s18 }
  0x63   : > { %359 = vrot.lane.b32.xlu0 %v2813_v32, %s2670_s18 }
  0x6a   : > { %433 = vrot.lane.b32.xlu2 %v238_v33, %s2671_s19  ;;  %431 = vrot.lane.b32.xlu1 %v237_v34, %s2671_s19 }
  0x6b   : > { %429 = vrot.lane.b32.xlu0 %v236_v35, %s2671_s19  ;;  %v2410_v35 = vld [vmem:[%s2706_s17 + $0x49] sm:$0xf] }
  0x6c   : > { %v2825_v36 = vpop.permute.xlu2 %307 }
  0x72   : > { %439 = vrot.lane.b32.xlu2 %v2828_v37, %s2671_s19  ;;  %437 = vrot.lane.b32.xlu1 %v240_v38, %s2671_s19  ;;  %v2406_v38 = vld [vmem:[%s2706_s17 + $0x29] sm:$0xf] }
  0x73   : > { %435 = vrot.lane.b32.xlu0 %v2832_v39, %s2671_s19 }
  0x74   : > { %v2839_v40 = vpop.permute.xlu2 %309 }
  0x7a   : > { %445 = vrot.lane.b32.xlu2 %v244_v41, %s2671_s19  ;;  %443 = vrot.lane.b32.xlu1 %v2843_v42, %s2671_s19 }
  0x7b   : > { %441 = vrot.lane.b32.xlu0 %v242_v43, %s2671_s19  ;;  %v2446_v43 = vld [vmem:[%s2706_s17 + $0x6a] sm:$0xf] }
  0x7c   : > { %v2850_v44 = vpop.permute.xlu2 %315 }
  0x82   : > { %451 = vrot.lane.b32.xlu2 %v247_v45, %s2671_s19  ;;  %449 = vrot.lane.b32.xlu1 %v246_v46, %s2671_s19  ;;  %v2438_v46 = vld [vmem:[%s2706_s17 + $0x2a] sm:$0xf] }
  0x83   : > { %447 = vrot.lane.b32.xlu0 %v2855_v47, %s2671_s19 }
  0x84   : > { %v2861_v48 = vpop.permute.xlu2 %321  ;;  %v2863_v49 = vpop.permute.xlu1 %303 }
  0x85   : > { %v2865_v50 = vpop.permute.xlu0 %299 }
  0x8a   : > { %457 = vrot.lane.b32.xlu2 %v250_v51, %s2671_s19  ;;  %455 = vrot.lane.b32.xlu1 %v2869_v52, %s2671_s19 }
  0x8b   : > { %453 = vrot.lane.b32.xlu0 %v248_v53, %s2671_s19 }
  0x8c   : > { %v2876_v54 = vpop.permute.xlu2 %327  ;;  %v2878_v55 = vpop.permute.xlu1 %305 }
  0x8d   : > { %4077 = vst [vmem:[#allocation2_spill] sm:$0xff] %v2876_v54  ;;  %v2880_v56 = vpop.permute.xlu0 %301 }
  0x92   : > { %463 = vrot.lane.b32.xlu2 %v2883_v57, %s2671_s19  ;;  %461 = vrot.lane.b32.xlu1 %v252_v58, %s2671_s19 }
  0x93   : > { %459 = vrot.lane.b32.xlu0 %v2887_v59, %s2671_s19 }
  0x94   : > { %v2894_v60 = vpop.permute.xlu2 %333  ;;  %v2896_v61 = vpop.permute.xlu1 %313 }
  0x95   : > { %v2898_v62 = vpop.permute.xlu0 %311 }
  0x9a   : > { %768 = vrot.lane.b32.xlu2 %v2712_v1, %s2670_s18  ;;  %467 = vrot.lane.b32.xlu1 %v2901_v63, %s2671_s19 }
  0x9b   : > { %465 = vrot.lane.b32.xlu0 %v254_v2, %s2671_s19 }
  0x9c   : > { %v2909_v3 = vpop.permute.xlu2 %339  ;;  %v2911_v4 = vpop.permute.xlu1 %319 }
  0x9d   : > { %4078 = vst [vmem:[#allocation3_spill] sm:$0xff] %v2909_v3  ;;  %v2913_v5 = vpop.permute.xlu0 %317  ;;  %v3095_v3 = vld [vmem:[%s2706_s17 + $0x10] sm:$0xff] }
  0x9e   : > { %4079 = vst [vmem:[#allocation4_spill] sm:$0xff] %v2913_v5 }
  0xa2   : > { %770 = vrot.lane.b32.xlu2 %v2404_v7, %s2670_s18  ;;  %469 = vrot.lane.b32.xlu1 %v256_v9, %s2671_s19 }
  0xa3   : > { %896 = vrot.lane.b32.xlu0 %v237_v34, %s2671_s19  ;;  %v2414_v34 = vld [vmem:[%s2706_s17 + $0x69] sm:$0xf] }
  0xa4   : > { %v2920_v1 = vpop.permute.xlu2 %345  ;;  %v2922_v11 = vpop.permute.xlu1 %325 }
  0xa5   : > { %4080 = vst [vmem:[#allocation5_spill] sm:$0xff] %v2920_v1  ;;  %v2924_v13 = vpop.permute.xlu0 %323 }
  0xa6   : > { %4081 = vst [vmem:[#allocation6_spill] sm:$0xff] %v2922_v11  ;;  %v2374_v11 = vld [vmem:[%s2706_s17 + $0x28] sm:$0xf] }
  0xaa   : > { %780 = vrot.lane.b32.xlu2 %v2727_v6, %s2670_s18  ;;  %778 = vrot.lane.b32.xlu1 %v2408_v15, %s2670_s18  ;;  %v2412_v15 = vld [vmem:[%s2706_s17 + $0x59] sm:$0xf] }
  0xab   : > { %772 = vrot.lane.b32.xlu0 %v2709_v0, %s2670_s18 }
  0xac   : > { %v2932_v17 = vpop.permute.xlu2 %351  ;;  %v2934_v19 = vpop.permute.xlu1 %331 }
  0xad   : > { %v2936_v21 = vpop.permute.xlu0 %329 }
  0xae   : > { %4082 = vst [vmem:[#allocation7_spill] sm:$0xff] %v2936_v21 }
  0xb2   : > { %906 = vrot.lane.b32.xlu2 %v2440_v23, %s2671_s19  ;;  %900 = vrot.lane.b32.xlu1 %v2832_v39, %s2671_s19 }
  0xb3   : > { %898 = vrot.lane.b32.xlu0 %v2436_v25, %s2671_s19  ;;  %v2420_v25 = vld [vmem:[%s2706_s17 + $0x99] sm:$0xf] }
  0xb4   : > { %v2944_v6 = vpop.permute.xlu2 %357  ;;  %v2946_v27 = vpop.permute.xlu1 %337 }
  0xb5   : > { %4083 = vst [vmem:[#allocation8_spill] sm:$0xff] %v2944_v6  ;;  %v2948_v29 = vpop.permute.xlu0 %335  ;;  %v3076_v6 = vld [vmem:[%s2706_s17 + $0xe2] sm:$0xff] }
  0xb6   : > { %4084 = vst [vmem:[#allocation9_spill] sm:$0xff] %v2946_v27 }
  0xb7   : > { %4085 = vst [vmem:[#allocation10_spill] sm:$0xff] %v2948_v29 }
  0xba   : > { %916 = vrot.lane.b32.xlu2 %v247_v45, %s2671_s19  ;;  %788 = vrot.lane.b32.xlu1 %v2752_v14, %s2670_s18  ;;  %v2442_v45 = vld [vmem:[%s2706_s17 + $0x4a] sm:$0xf] }
  0xbb   : > { %908 = vrot.lane.b32.xlu0 %v2843_v42, %s2671_s19 }
  0xbc   : > { %v2955_v30 = vpop.permute.xlu2 %427  ;;  %v2957_v31 = vpop.permute.xlu1 %343 }
  0xbd   : > { %v2959_v33 = vpop.permute.xlu0 %341 }
  0xc2   : > { %790 = vrot.lane.b32.xlu2 %v2414_v34, %s2670_s18  ;;  %782 = vrot.lane.b32.xlu1 %v2410_v35, %s2670_s18  ;;  %v2416_v34 = vld [vmem:[%s2706_s17 + $0x79] sm:$0xf] }
  0xc3   : > { %774 = vrot.lane.b32.xlu0 %v2406_v38, %s2670_s18  ;;  %v2424_v38 = vld [vmem:[%s2706_s17 + $0xb9] sm:$0xf] }
  0xc4   : > { %v2967_v14 = vpop.permute.xlu2 %433  ;;  %v2969_v41 = vpop.permute.xlu1 %349 }
  0xc5   : > { %4086 = vst [vmem:[#allocation11_spill] sm:$0xff] %v2969_v41  ;;  %v2971_v42 = vpop.permute.xlu0 %347  ;;  %v2422_v41 = vld [vmem:[%s2706_s17 + $0xa9] sm:$0xf] }
  0xc6   : > { %4087 = vst [vmem:[#allocation12_spill] sm:$0xff] %v2971_v42  ;;  %v2418_v42 = vld [vmem:[%s2706_s17 + $0x89] sm:$0xf] }
  0xca   : > { %918 = vrot.lane.b32.xlu2 %v2446_v43, %s2671_s19  ;;  %910 = vrot.lane.b32.xlu1 %v2442_v45, %s2671_s19 }
  0xcb   : > { %902 = vrot.lane.b32.xlu0 %v2438_v46, %s2671_s19  ;;  %v2448_v46 = vld [vmem:[%s2706_s17 + $0x7a] sm:$0xf] }
  0xcc   : > { %v2979_v51 = vpop.permute.xlu2 %439  ;;  %v2981_v53 = vpop.permute.xlu1 %355 }
  0xcd   : > { %4088 = vst [vmem:[#allocation13_spill] sm:$0xff] %v2981_v53  ;;  %v2983_v58 = vpop.permute.xlu0 %353  ;;  %v2454_v53 = vld [vmem:[%s2706_s17 + $0xaa] sm:$0xf] }
  0xce   : > { %4089 = vst [vmem:[#allocation14_spill] sm:$0xff] %v2983_v58  ;;  %v2464_v58 = vld [vmem:[%s2706_s17 + $0xfa] sm:$0xf] }
  0xd2   : > { %792 = vrot.lane.b32.xlu2 %v2748_v12, %s2670_s18  ;;  %784 = vrot.lane.b32.xlu1 %v2740_v10, %s2670_s18 }
  0xd3   : > { %776 = vrot.lane.b32.xlu0 %v2731_v8, %s2670_s18 }
  0xd4   : > { %v2991_v2 = vpop.permute.xlu2 %445  ;;  %v2993_v7 = vpop.permute.xlu1 %361 }
  0xd5   : > { %4090 = vst [vmem:[#allocation15_spill] sm:$0xff] %v2991_v2  ;;  %v2995_v9 = vpop.permute.xlu0 %359 }
  0xd6   : > { %4091 = vst [vmem:[#allocation16_spill] sm:$0xff] %v2993_v7 }
  0xd7   : > { %4092 = vst [vmem:[#allocation17_spill] sm:$0xff] %v2995_v9  ;;  %v3079_v9 = vld [vmem:[%s2706_s17 + $0xc2] sm:$0xff] }
  0xda   : > { %912 = vrot.lane.b32.xlu2 %v2855_v47, %s2671_s19  ;;  %904 = vrot.lane.b32.xlu1 %v2828_v37, %s2671_s19 }
  0xdb   : > { %800 = vrot.lane.b32.xlu0 %v2773_v20, %s2670_s18 }
  0xdc   : > { %v3003_v10 = vpop.permute.xlu2 %451  ;;  %v3005_v8 = vpop.permute.xlu1 %431 }
  0xdd   : > { %v3007_v12 = vpop.permute.xlu0 %429 }
  0xe2   : > { %786 = vrot.lane.b32.xlu2 %v2412_v15, %s2670_s18  ;;  %928 = vrot.lane.b32.xlu1 %v2883_v57, %s2671_s19  ;;  %v2444_v15 = vld [vmem:[%s2706_s17 + $0x5a] sm:$0xf] }
  0xe3   : > { %920 = vrot.lane.b32.xlu0 %v2869_v52, %s2671_s19 }
  0xe4   : > { %v3015_v47 = vpop.permute.xlu2 %457  ;;  %v3017_v23 = vpop.permute.xlu1 %437 }
  0xe5   : > { %4093 = vst [vmem:[#allocation18_spill] sm:$0xff] %v3015_v47  ;;  %v3019_v20 = vpop.permute.xlu0 %435 }
  0xea   : > { %802 = vrot.lane.b32.xlu2 %v2420_v25, %s2670_s18  ;;  %796 = vrot.lane.b32.xlu1 %v2761_v16, %s2670_s18 }
  0xeb   : > { %794 = vrot.lane.b32.xlu0 %v2416_v34, %s2670_s18  ;;  %v1105_v34 = vld [vmem:[%s4071_s1 + $0x14] sm:$0xf] }
  0xec   : > { %v3027_v57 = vpop.permute.xlu2 %463  ;;  %v3029_v52 = vpop.permute.xlu1 %443  ;;  %2467 = vmatpush.msk.msra.mxu0 %vm1234_vm0, %v1105_v34  ;;  %2640 = vmatpush.msk.msra.mxu3 %vm1234_vm0, %v1105_v34 }
  0xed   : > { %4094 = vst [vmem:[#allocation19_spill] sm:$0xff] %v3027_v57  ;;  %v3031_v35 = vpop.permute.xlu0 %441 }
  0xf2   : > { %812 = vrot.lane.b32.xlu2 %v2794_v26, %s2670_s18  ;;  %810 = vrot.lane.b32.xlu1 %v2424_v38, %s2670_s18  ;;  %v1104_v38 = vld [vmem:[%s4071_s1 + $0xc] sm:$0xff] }
  0xf3   : > { %804 = vrot.lane.b32.xlu0 %v2769_v18, %s2670_s18  ;;  %1253 = vmatpush.msra.mxu0 %v1104_v38 }
  0xf4   : > { %v769_v43 = vpop.permute.xlu2 %768  ;;  %v3039_v16 = vpop.permute.xlu1 %449  ;;  %2641 = vmatpush.msra.mxu3 %v1104_v38 }
  0xf5   : > { %v3041_v45 = vpop.permute.xlu0 %447 }
  0xfa   : > { %924 = vrot.lane.b32.xlu2 %v2887_v59, %s2671_s19  ;;  %922 = vrot.lane.b32.xlu1 %v2448_v46, %s2671_s19  ;;  %v2456_v59 = vld [vmem:[%s2706_s17 + $0xba] sm:$0xf] }
  0xfb   : > { %914 = vrot.lane.b32.xlu0 %v2444_v15, %s2671_s19  ;;  %v2452_v46 = vld [vmem:[%s2706_s17 + $0x9a] sm:$0xf] }
  0xfc   : > { %v3049_v26 = vpop.permute.xlu2 %770  ;;  %v3051_v25 = vpop.permute.xlu1 %455 }
  0xfd   : > { %4095 = vst [vmem:[#allocation20_spill] sm:$0xff] %v3051_v25  ;;  %v3053_v18 = vpop.permute.xlu0 %453  ;;  %v2462_v25 = vld [vmem:[%s2706_s17 + $0xea] sm:$0xf] }
  0xfe   : > { %4096 = vst [vmem:[#allocation21_spill] sm:$0xff] %v3053_v18 }
 0x102   : > { %938 = vrot.lane.b32.xlu2 %v2456_v59, %s2671_s19  ;;  %932 = vrot.lane.b32.xlu1 %v2901_v63, %s2671_s19 }
 0x103   : > { %930 = vrot.lane.b32.xlu0 %v2452_v46, %s2671_s19  ;;  %v2426_v46 = vld [vmem:[%s2706_s17 + $0xc9] sm:$0xf] }
 0x104   : > { %v3069_v15 = vpop.permute.xlu2 %780  ;;  %v3071_v34 = vpop.permute.xlu1 %461 }
 0x105   : > { %4097 = vst [vmem:[#allocation22_spill] sm:$0xff] %v3071_v34  ;;  %v3073_v7 = vpop.permute.xlu0 %459 }
 0x10a   : > { %948 = vrot.lane.b32.xlu2 %v3076_v6, %s2671_s19  ;;  %820 = vrot.lane.b32.xlu1 %v2803_v28, %s2670_s18  ;;  %v992_v28 = vsel %vm523_vm1, %v3095_v3, %v769_v43 }
 0x10b   : > { %940 = vrot.lane.b32.xlu0 %v3079_v9, %s2671_s19 }
 0x10c   : > { %v907_v63 = vpop.permute.xlu2 %906  ;;  %v3087_v59 = vpop.permute.xlu1 %467 }
 0x10d   : > { %4098 = vst [vmem:[#allocation23_spill] sm:$0xff] %v3087_v59  ;;  %v3089_v38 = vpop.permute.xlu0 %465 }
 0x10e   : > { %4099 = vst [vmem:[#allocation24_spill] sm:$0xff] %v3089_v38 }
 0x112   : > { %814 = vrot.lane.b32.xlu2 %v2426_v46, %s2670_s18  ;;  %806 = vrot.lane.b32.xlu1 %v2422_v41, %s2670_s18  ;;  %v2450_v46 = vld [vmem:[%s2706_s17 + $0x8a] sm:$0xf] }
 0x113   : > { %798 = vrot.lane.b32.xlu0 %v2418_v42, %s2670_s18  ;;  %v2430_v41 = vld [vmem:[%s2706_s17 + $0xe9] sm:$0xf]  ;;  %v2376_v42 = vld [vmem:[%s2706_s17 + $0x38] sm:$0xf] }
 0x114   : > { %v917_v59 = vpop.permute.xlu2 %916  ;;  %v3102_v38 = vpop.permute.xlu1 %469 }
 0x115   : > { %v897_v27 = vpop.permute.xlu0 %896 }
 0x116   : > { %v1024_v47 = vsel %vm556_vm2, %v992_v28, %v897_v27 }
 0x117   : > { %v1088_v21 = vrot.slane %v1024_v47, 4  ;;  %1106 = vst [vmem:[#allocation1] ss:$2 sm:$0xff] %v1024_v47 }
 0x119   : > { %1108 = vst [vmem:[#allocation1 + $0x1] ss:$2 sm:$0xff] %v1088_v21  ;;  %v2458_v21 = vld [vmem:[%s2706_s17 + $0xca] sm:$0xf] }
 0x11a   : > { %934 = vrot.lane.b32.xlu2 %v2454_v53, %s2671_s19  ;;  %926 = vrot.lane.b32.xlu1 %v2450_v46, %s2671_s19  ;;  %v2372_v53 = vld [vmem:[%s2706_s17 + $0x18] sm:$0xf]  ;;  %v3122_v46 = vld [vmem:[%s2706_s17 + $0x20] sm:$0xff] }
 0x11b   : > { %822 = vrot.lane.b32.xlu0 %v2430_v41, %s2670_s18 }
 0x11c   : > { %v791_v43 = vpop.permute.xlu2 %790  ;;  %v779_v1 = vpop.permute.xlu1 %778 }
 0x11d   : > { %v997_v27 = vsel %vm523_vm1, %v2376_v42, %v779_v1  ;;  %v773_v28 = vpop.permute.xlu0 %772 }
 0x11e   : > { %v1029_v47 = vsel %vm556_vm2, %v997_v27, %v907_v63  ;;  %v994_v1 = vsel %vm523_vm1, %v3122_v46, %v773_v28  ;;  %v3144_v28 = vld [vmem:[%s2706_s17 + $0x60] sm:$0xff] }
 0x120   : > { %v1121_v18 = vld.sshfl [vmem:[#allocation1] sm:$0xff pattern:$0x75316420] }
 0x121   : > { %1125 = vst [vmem:[#allocation1] ss:$2 sm:$0xff] %v1029_v47  ;;  %2468 = vmatmul.msk.f32.vlgmr.msra.gmra.mxu0 %vm1185_vm3, %v1121_v18  ;;  %v993_v18 = vsel %vm523_vm1, %v2372_v53, %v3049_v26  ;;  %v3132_v47 = vld [vmem:[%s2706_s17 + $0xb2] sm:$0xff]  ;;  %v3141_v26 = vld [vmem:[%s2706_s17 + $0x40] sm:$0xff] }
 0x122   : > { %808 = vrot.lane.b32.xlu2 %v2782_v22, %s2670_s18  ;;  %950 = vrot.lane.b32.xlu1 %v2462_v25, %s2671_s19 }
 0x123   : > { %942 = vrot.lane.b32.xlu0 %v2458_v21, %s2671_s19 }
 0x124   : > { %v919_v63 = vpop.permute.xlu2 %918  ;;  %v901_v41 = vpop.permute.xlu1 %900 }
 0x125   : > { %v1026_v42 = vsel %vm556_vm2, %v994_v1, %v901_v41  ;;  %v899_v27 = vpop.permute.xlu0 %898  ;;  %v998_v1 = vsel %vm523_vm1, %v3141_v26, %v3069_v15  ;;  %v2459_v15 = vld [vmem:[%s2706_s17 + $0xd2] sm:$0xff] }
 0x126   : > { %v1089_v22 = vrot.slane %v1026_v42, 4  ;;  %1112 = vst [vmem:[#allocation1 + $0x11] ss:$2 sm:$0xff] %v1026_v42  ;;  %v1025_v25 = vsel %vm556_vm2, %v993_v18, %v899_v27  ;;  %v2382_v18 = vld [vmem:[%s2706_s17 + $0x68] sm:$0xf] }
 0x127   : > { %1110 = vst [vmem:[#allocation1 + $0x10] ss:$2 sm:$0xff] %v1025_v25  ;;  %v3158_v25 = vld [vmem:[%s2706_s17 + $0xf2] sm:$0xff] }
 0x128   : > { %1114 = vst [vmem:[#allocation1 + $0x20] ss:$2 sm:$0xff] %v1089_v22  ;;  %v2428_v22 = vld [vmem:[%s2706_s17 + $0xd9] sm:$0xf] }
 0x12a   : > { %936 = vrot.lane.b32.xlu2 %v3132_v47, %s2671_s19  ;;  %824 = vrot.lane.b32.xlu1 %v2813_v32, %s2670_s18 }
 0x12b   : > { %816 = vrot.lane.b32.xlu0 %v2790_v24, %s2670_s18 }
 0x12c   : > { %v3146_v21 = vpop.permute.xlu2 %792  ;;  %v789_v53 = vpop.permute.xlu1 %788 }
 0x12d   : > { %v1002_v41 = vsel %vm523_vm1, %v3144_v28, %v789_v53  ;;  %v909_v32 = vpop.permute.xlu0 %908  ;;  %v1003_v53 = vsel %vm523_vm1, %v2382_v18, %v791_v43  ;;  %v2433_v43 = vld [vmem:[%s2706_s17 + $0x101] sm:$0xff]  ;;  %v2432_v18 = vld [vmem:[%s2706_s17 + $0xf9] sm:$0xf] }
 0x12e   : > { %v1122_v42 = vld.sshfl [vmem:[#allocation1 + $0x10] sm:$0xff pattern:$0x75316420]  ;;  %v1030_v24 = vsel %vm556_vm2, %v998_v1, %v909_v32  ;;  %v3161_v54 = vsel %vm556_vm2, %v1002_v41, %v917_v59  ;;  %v1035_v59 = vsel %vm556_vm2, %v1003_v53, %v919_v63 }
 0x12f   : > { %v1091_v27 = vrot.slane %v1030_v24, 4  ;;  %1126 = vst [vmem:[#allocation1 + $0x1] ss:$2 sm:$0xff] %v1030_v24  ;;  %2469 = vmatmul.msk.f32.gmra.mxu0 %vm1185_vm3, %v1122_v42  ;;  %v1093_v1 = vrot.slane %v3161_v54, 4 }
 0x131   : > { %1127 = vst [vmem:[#allocation1 + $0x10] ss:$2 sm:$0xff] %v1091_v27  ;;  %v2460_v27 = vld [vmem:[%s2706_s17 + $0xda] sm:$0xf] }
 0x132   : > { %818 = vrot.lane.b32.xlu2 %v2428_v22, %s2670_s18  ;;  %952 = vrot.lane.b32.xlu1 %v3158_v25, %s2671_s19  ;;  %v2378_v22 = vld [vmem:[%s2706_s17 + $0x48] sm:$0xf] }
 0x133   : > { %944 = vrot.lane.b32.xlu0 %v2459_v15, %s2671_s19 }
 0x134   : > { %v913_v32 = vpop.permute.xlu2 %912  ;;  %v783_v42 = vpop.permute.xlu1 %782 }
 0x135   : > { %v775_v41 = vpop.permute.xlu0 %774  ;;  %v999_v63 = vsel %vm523_vm1, %v2378_v22, %v783_v42  ;;  %v3194_v42 = vld [vmem:[%s2706_s17 + $0x50] sm:$0xff] }
 0x136   : > { %v3171_v24 = vld.sshfl [vmem:[#allocation1] sm:$0xff pattern:$0x75316420] }
 0x137   : > { %1137 = vst [vmem:[#allocation1] ss:$2 sm:$0xff] %v1093_v1 }
 0x138   : > { %1138 = vst [vmem:[#allocation1 + $0x1] ss:$2 sm:$0xff] %v1035_v59  ;;  %v995_v59 = vsel %vm523_vm1, %v2374_v11, %v775_v41 }
 0x13a   : > { %946 = vrot.lane.b32.xlu2 %v2460_v27, %s2671_s19  ;;  %828 = vrot.lane.b32.xlu1 %v2433_v43, %s2670_s18  ;;  %v2434_v27 = vld [vmem:[%s2706_s17 + $0x109] sm:$0xf] }
 0x13b   : > { %826 = vrot.lane.b32.xlu0 %v2432_v18, %s2670_s18  ;;  %v2465_v43 = vld [vmem:[%s2706_s17 + $0x102] sm:$0xff] }
 0x13c   : > { %v3182_v53 = vpop.permute.xlu2 %786  ;;  %v911_v1 = vpop.permute.xlu1 %910 }
 0x13d   : > { %v1031_v2 = vsel %vm556_vm2, %v999_v63, %v911_v1  ;;  %v903_v5 = vpop.permute.xlu0 %902  ;;  %v2466_v63 = vld [vmem:[%s2706_s17 + $0x10a] sm:$0xf] }
 0x13e   : > { %1128 = vst [vmem:[#allocation1 + $0x11] ss:$2 sm:$0xff] %v1031_v2  ;;  %v1027_v57 = vsel %vm556_vm2, %v995_v59, %v903_v5 }
 0x13f   : > { %1116 = vst [vmem:[#allocation1 + $0x21] ss:$2 sm:$0xff] %v1027_v57 }
 0x142   : > { %830 = vrot.lane.b32.xlu2 %v2434_v27, %s2670_s18  ;;  %956 = vrot.lane.b32.xlu1 %v2465_v43, %s2671_s19 }
 0x143   : > { %954 = vrot.lane.b32.xlu0 %v2464_v58, %s2671_s19  ;;  %v3207_v58 = vld [vmem:[%s2706_s17 + $0x30] sm:$0xff] }
 0x144   : > { %v3196_v11 = vpop.permute.xlu2 %802  ;;  %v785_v41 = vpop.permute.xlu1 %784 }
 0x145   : > { %v1000_v5 = vsel %vm523_vm1, %v3194_v42, %v785_v41  ;;  %v777_v2 = vpop.permute.xlu0 %776 }
 0x146   : > { %v1123_v57 = vld.sshfl [vmem:[#allocation1 + $0x20] sm:$0xff pattern:$0x75316420]  ;;  %v1032_v18 = vsel %vm556_vm2, %v1000_v5, %v913_v32  ;;  %v996_v32 = vsel %vm523_vm1, %v3207_v58, %v777_v2  ;;  %v258_v5 = vld [vmem:[%s2706_s17 + $0xba] sm:$0xf]  ;;  %v3225_v2 = vld [vmem:[%s2706_s17 + $0x70] sm:$0xff] }
 0x147   : > { %v1092_v22 = vrot.slane %v1032_v18, 4  ;;  %1129 = vst [vmem:[#allocation1 + $0x20] ss:$2 sm:$0xff] %v1032_v18  ;;  %2470 = vmatmul.msk.f32.gmra.mxu0 %vm1185_vm3, %v1123_v57  ;;  %v3221_v57 = vld [vmem:[%s2706_s17 + $0x90] sm:$0xff] }
 0x149   : > { %1130 = vst [vmem:[#allocation1 + $0x21] ss:$2 sm:$0xff] %v1092_v22 }
 0x14a   : > { %479 = vrot.lane.b32.xlu2 %v2459_v15, %s2671_s19  ;;  %471 = vrot.lane.b32.xlu1 %v3132_v47, %s2671_s19  ;;  %v262_v15 = vld [vmem:[%s2706_s17 + $0xda] sm:$0xf] }
 0x14b   : > { %958 = vrot.lane.b32.xlu0 %v2466_v63, %s2671_s19 }
 0x14c   : > { %v3212_v1 = vpop.permute.xlu2 %812  ;;  %v905_v59 = vpop.permute.xlu1 %904 }
 0x14d   : > { %v1028_v27 = vsel %vm556_vm2, %v996_v32, %v905_v59  ;;  %v801_v43 = vpop.permute.xlu0 %800  ;;  %v1004_v32 = vsel %vm523_vm1, %v3225_v2, %v3146_v21  ;;  %v3232_v59 = vld.sshfl [vmem:[#allocation1] sm:$0xff pattern:$0x75316420] }
 0x14e   : > { %v1090_v41 = vrot.slane %v1028_v27, 4  ;;  %1118 = vst [vmem:[#allocation1 + $0x30] ss:$2 sm:$0xff] %v1028_v27  ;;  %v1008_v18 = vsel %vm523_vm1, %v3221_v57, %v801_v43  ;;  %v3245_v21 = vld [vmem:[%s2706_s17 + $0x80] sm:$0xff] }
 0x150   : > { %1120 = vst [vmem:[#allocation1 + $0x31] ss:$2 sm:$0xff] %v1090_v41  ;;  %v1134_v41 = vld.sshfl [vmem:[#allocation1 + $0x10] sm:$0xff pattern:$0x75316420] }
 0x152   : > { %1675 = vrot.lane.b32.xlu2 %v2709_v0, %s2670_s18  ;;  %481 = vrot.lane.b32.xlu1 %v262_v15, %s2671_s19 }
 0x153   : > { %473 = vrot.lane.b32.xlu0 %v258_v5, %s2671_s19 }
 0x154   : > { %v925_v22 = vpop.permute.xlu2 %924  ;;  %v929_v63 = vpop.permute.xlu1 %928 }
 0x155   : > { %v1040_v0 = vsel %vm556_vm2, %v1008_v18, %v929_v63  ;;  %v921_v27 = vpop.permute.xlu0 %920  ;;  %v1135_v63 = vld.sshfl [vmem:[#allocation1 + $0x20] sm:$0xff pattern:$0x75316420] }
 0x156   : > { %v1096_v15 = vrot.slane %v1040_v0, 4  ;;  %1149 = vst [vmem:[#allocation1] ss:$2 sm:$0xff] %v1040_v0  ;;  %v1036_v5 = vsel %vm556_vm2, %v1004_v32, %v921_v27  ;;  %v2551_v32 = vld [vmem:[%s2706_s17 + $0x31] sm:$0xff] }
 0x157   : > { %v1124_v34 = vld.sshfl [vmem:[#allocation1 + $0x30] sm:$0xff pattern:$0x75316420]  ;;  %v1094_v29 = vrot.slane %v1036_v5, 4  ;;  %1139 = vst [vmem:[#allocation1 + $0x10] ss:$2 sm:$0xff] %v1036_v5 }
 0x158   : > { %1132 = vst [vmem:[#allocation1 + $0x31] ss:$2 sm:$0xff] %v3161_v54  ;;  %2471 = vmatmul.msk.f32.gmra.mxu0 %vm1185_vm3, %v1124_v34 }
 0x159   : > { %1150 = vst [vmem:[#allocation1 + $0x1] ss:$2 sm:$0xff] %v1096_v15 }
 0x15a   : > { %1140 = vst [vmem:[#allocation1 + $0x11] ss:$2 sm:$0xff] %v1094_v29  ;;  %1803 = vrot.lane.b32.xlu2 %v2832_v39, %s2671_s19  ;;  %483 = vrot.lane.b32.xlu1 %v3076_v6, %s2671_s19  ;;  %v260_v39 = vld [vmem:[%s2706_s17 + $0xca] sm:$0xf] }
 0x15b   : > { %475 = vrot.lane.b32.xlu0 %v3079_v9, %s2671_s19  ;;  %v2550_v6 = vld [vmem:[%s2706_s17 + $0x29] sm:$0xf]  ;;  %v2392_v9 = vld [vmem:[%s2706_s17 + $0xb8] sm:$0xf] }
 0x15c   : > { %v939_v43 = vpop.permute.xlu2 %938  ;;  %v797_v54 = vpop.permute.xlu1 %796 }
 0x15d   : > { %v1006_v34 = vsel %vm523_vm1, %v3245_v21, %v797_v54  ;;  %v795_v18 = vpop.permute.xlu0 %794  ;;  %v2582_v54 = vld [vmem:[%s2706_s17 + $0x2a] sm:$0xf] }
 0x15e   : > { %v1038_v29 = vsel %vm556_vm2, %v1006_v34, %v925_v22  ;;  %v264_v34 = vld [vmem:[%s2706_s17 + $0xea] sm:$0xf] }
 0x15f   : > { %1142 = vst [vmem:[#allocation1 + $0x21] ss:$2 sm:$0xff] %v1038_v29 }
 0x160   : > { %2472 = vmatmul.msk.f32.gmra.mxu0 %vm1185_vm3, %v3171_v24  ;;  %v3262_v5 = vld.sshfl [vmem:[#allocation1] sm:$0xff pattern:$0x75316420] }
 0x162   : > { %477 = vrot.lane.b32.xlu2 %v260_v39, %s2671_s19  ;;  %1679 = vrot.lane.b32.xlu1 %v2551_v32, %s2670_s18  ;;  %v2384_v39 = vld [vmem:[%s2706_s17 + $0x78] sm:$0xf] }
 0x163   : > { %1677 = vrot.lane.b32.xlu0 %v2550_v6, %s2670_s18  ;;  %v2380_v32 = vld [vmem:[%s2706_s17 + $0x58] sm:$0xf] }
 0x164   : > { %v3259_v0 = vpop.permute.xlu2 %948  ;;  %v811_v22 = vpop.permute.xlu1 %810 }
 0x165   : > { %v1013_v27 = vsel %vm523_vm1, %v2392_v9, %v811_v22  ;;  %v805_v15 = vpop.permute.xlu0 %804 }
 0x166   : > { %v1045_v24 = vsel %vm556_vm2, %v1013_v27, %v939_v43  ;;  %v1005_v43 = vsel %vm523_vm1, %v2384_v39, %v795_v18  ;;  %v3288_v18 = vld [vmem:[%s2706_s17 + $0xa0] sm:$0xff] }
 0x167   : > { %1161 = vst [vmem:[#allocation1] ss:$2 sm:$0xff] %v1045_v24 }
 0x168   : > { %2473 = vmatmul.msk.f32.gmra.mxu0 %vm1185_vm3, %v1134_v41  ;;  %v1001_v41 = vsel %vm523_vm1, %v2380_v32, %v3182_v53  ;;  %4100 = vst [vmem:[#allocation25_spill] sm:$0xff] %v3288_v18  ;;  %v1010_v53 = vsel %vm523_vm1, %v3288_v18, %v805_v15 }
 0x16a   : > { %1805 = vrot.lane.b32.xlu2 %v2582_v54, %s2671_s19  ;;  %487 = vrot.lane.b32.xlu1 %v3158_v25, %s2671_s19  ;;  %v266_v54 = vld [vmem:[%s2706_s17 + $0xfa] sm:$0xf] }
 0x16b   : > { %485 = vrot.lane.b32.xlu0 %v264_v34, %s2671_s19  ;;  %v2552_v25 = vld [vmem:[%s2706_s17 + $0x39] sm:$0xf] }
 0x16c   : > { %v3275_v6 = vpop.permute.xlu2 %814  ;;  %v923_v9 = vpop.permute.xlu1 %922  ;;  %v2388_v34 = vld [vmem:[%s2706_s17 + $0x98] sm:$0xf] }
 0x16d   : > { %v1037_v22 = vsel %vm556_vm2, %v1005_v43, %v923_v9  ;;  %v915_v27 = vpop.permute.xlu0 %914  ;;  %v1146_v43 = vld.sshfl [vmem:[#allocation1 + $0x10] sm:$0xff pattern:$0x75316420]  ;;  %v1095_v9 = vrot.slane %v1038_v29, 4  ;;  %v3308_v29 = vld [vmem:[%s2706_s17 + $0xc0] sm:$0xff] }
 0x16e   : > { %1141 = vst [vmem:[#allocation1 + $0x20] ss:$2 sm:$0xff] %v1037_v22  ;;  %v1033_v24 = vsel %vm556_vm2, %v1001_v41, %v915_v27  ;;  %v2553_v27 = vld [vmem:[%s2706_s17 + $0x41] sm:$0xff] }
 0x16f   : > { %1131 = vst [vmem:[#allocation1 + $0x30] ss:$2 sm:$0xff] %v1033_v24 }
 0x170   : > { %2474 = vmatmul.msk.f32.gmra.mxu0 %vm1185_vm3, %v1135_v63  ;;  %v1009_v63 = vsel %vm523_vm1, %v2388_v34, %v3196_v11  ;;  %v2584_v11 = vld [vmem:[%s2706_s17 + $0x3a] sm:$0xf]  ;;  %4101 = vst [vmem:[#allocation26_spill] sm:$0xff] %v3308_v29  ;;  %v3311_v34 = vld [vmem:[%s2706_s17 + $0xe0] sm:$0xff] }
 0x171   : > { %4102 = vst [vmem:[#allocation27_spill] sm:$0xff] %v3311_v34 }
 0x172   : > { %489 = vrot.lane.b32.xlu2 %v266_v54, %s2671_s19  ;;  %1681 = vrot.lane.b32.xlu1 %v2552_v25, %s2670_s18  ;;  %v2585_v25 = vld [vmem:[%s2706_s17 + $0x42] sm:$0xff] }
 0x173   : > { %1807 = vrot.lane.b32.xlu0 %v2828_v37, %s2671_s19 }
 0x174   : > { %v935_v39 = vpop.permute.xlu2 %934  ;;  %v933_v32 = vpop.permute.xlu1 %932 }
 0x175   : > { %v1042_v41 = vsel %vm556_vm2, %v1010_v53, %v933_v32  ;;  %v931_v22 = vpop.permute.xlu0 %930  ;;  %v3299_v15 = vld.sshfl [vmem:[#allocation1 + $0x20] sm:$0xff pattern:$0x75316420] }
 0x176   : > { %v1136_v24 = vld.sshfl [vmem:[#allocation1 + $0x30] sm:$0xff pattern:$0x75316420]  ;;  %v1097_v37 = vrot.slane %v1042_v41, 4  ;;  %1152 = vst [vmem:[#allocation1 + $0x11] ss:$2 sm:$0xff] %v1042_v41  ;;  %v1041_v54 = vsel %vm556_vm2, %v1009_v63, %v931_v22  ;;  %v1014_v63 = vsel %vm523_vm1, %v3308_v29, %v3212_v1 }
 0x177   : > { %1143 = vst [vmem:[#allocation1 + $0x30] ss:$2 sm:$0xff] %v1095_v9  ;;  %v2554_v1 = vld [vmem:[%s2706_s17 + $0x49] sm:$0xf] }
 0x178   : > { %1153 = vst [vmem:[#allocation1 + $0x20] ss:$2 sm:$0xff] %v1097_v37  ;;  %2475 = vmatmul.msk.f32.gmra.mxu0 %vm1185_vm3, %v1136_v24  ;;  %v2555_v24 = vld [vmem:[%s2706_s17 + $0x51] sm:$0xff]  ;;  %v2586_v37 = vld [vmem:[%s2706_s17 + $0x4a] sm:$0xf] }
 0x179   : > { %1151 = vst [vmem:[#allocation1 + $0x10] ss:$2 sm:$0xff] %v1041_v54  ;;  %v2386_v29 = vld [vmem:[%s2706_s17 + $0x88] sm:$0xf] }
 0x17a   : > { %1683 = vrot.lane.b32.xlu1 %v2553_v27, %s2670_s18  ;;  %1811 = vrot.lane.b32.xlu2 %v2585_v25, %s2671_s19 }
 0x17b   : > { %1809 = vrot.lane.b32.xlu0 %v2584_v11, %s2671_s19  ;;  %v2390_v11 = vld [vmem:[%s2706_s17 + $0xa8] sm:$0xf] }
 0x17c   : > { %v809_v53 = vpop.permute.xlu2 %808  ;;  %v821_v32 = vpop.permute.xlu1 %820 }
 0x17d   : > { %v1018_v9 = vsel %vm523_vm1, %v3311_v34, %v821_v32  ;;  %v941_v41 = vpop.permute.xlu0 %940  ;;  %v2590_v34 = vld [vmem:[%s2706_s17 + $0x6a] sm:$0xf] }
 0x17e   : > { %v1046_v22 = vsel %vm556_vm2, %v1014_v63, %v941_v41  ;;  %v3325_v25 = vsel %vm556_vm2, %v1018_v9, %v3259_v0 }
 0x17f   : > { %v1099_v27 = vrot.slane %v1046_v22, 4  ;;  %1162 = vst [vmem:[#allocation1 + $0x1] ss:$2 sm:$0xff] %v1046_v22  ;;  %v1101_v32 = vrot.slane %v3325_v25, 4 }
 0x180   : > { %v3321_v54 = vld.sshfl [vmem:[#allocation1 + $0x10] sm:$0xff pattern:$0x75316420]  ;;  %2476 = vmatmul.msk.f32.gmra.mxu0 %vm1185_vm3, %v3232_v59 }
 0x181   : > { %1163 = vst [vmem:[#allocation1 + $0x10] ss:$2 sm:$0xff] %v1099_v27  ;;  %v2556_v27 = vld [vmem:[%s2706_s17 + $0x59] sm:$0xf] }
 0x182   : > { %1687 = vrot.lane.b32.xlu1 %v2555_v24, %s2670_s18  ;;  %1813 = vrot.lane.b32.xlu2 %v2586_v37, %s2671_s19  ;;  %v2588_v24 = vld [vmem:[%s2706_s17 + $0x5a] sm:$0xf]  ;;  %v2587_v37 = vld [vmem:[%s2706_s17 + $0x52] sm:$0xff] }
 0x183   : > { %1685 = vrot.lane.b32.xlu0 %v2554_v1, %s2670_s18  ;;  %v638_v1 = vld [vmem:[%s4071_s1 + $0x8] sm:$0xf] }
 0x184   : > { %v937_v0 = vpop.permute.xlu2 %936  ;;  %v807_v63 = vpop.permute.xlu1 %806  ;;  %2492 = vmatpush.msk.msra.mxu1 %vm1234_vm0, %v638_v1  ;;  %2642 = vmatpush.msk.msrb.mxu3 %vm1234_vm0, %v638_v1  ;;  %v2394_v1 = vld [vmem:[%s2706_s17 + $0xc8] sm:$0xf] }
 0x185   : > { %v1011_v9 = vsel %vm523_vm1, %v2390_v11, %v807_v63  ;;  %v799_v41 = vpop.permute.xlu0 %798 }
 0x186   : > { %v3336_v59 = vld.sshfl [vmem:[#allocation1] sm:$0xff pattern:$0x75316420]  ;;  %v1043_v22 = vsel %vm556_vm2, %v1011_v9, %v935_v39  ;;  %v1007_v11 = vsel %vm523_vm1, %v2386_v29, %v799_v41  ;;  %v2398_v41 = vld [vmem:[%s2706_s17 + $0xe8] sm:$0xf] }
 0x187   : > { %1173 = vst [vmem:[#allocation1] ss:$2 sm:$0xff] %v1101_v32  ;;  %v637_v39 = vld [vmem:[%s4071_s1] sm:$0xff] }
 0x188   : > { %1154 = vst [vmem:[#allocation1 + $0x21] ss:$2 sm:$0xff] %v1043_v22  ;;  %2477 = vmatmul.msk.f32.gmra.mxu0 %vm1185_vm3, %v1146_v43  ;;  %v3355_v43 = vld [vmem:[%s2706_s17 + $0xb0] sm:$0xff]  ;;  %1472 = vmatpush.msra.mxu1 %v637_v39  ;;  %v2557_v29 = vld [vmem:[%s2706_s17 + $0x61] sm:$0xff] }
 0x189   : > { %v1012_v9 = vsel %vm523_vm1, %v3355_v43, %v809_v53  ;;  %2643 = vmatpush.msrb.mxu3 %v637_v39 }
 0x18a   : > { %1689 = vrot.lane.b32.xlu1 %v2556_v27, %s2670_s18  ;;  %1817 = vrot.lane.b32.xlu2 %v2588_v24, %s2671_s19  ;;  %v2589_v24 = vld [vmem:[%s2706_s17 + $0x62] sm:$0xff]  ;;  %v1044_v18 = vsel %vm556_vm2, %v1012_v9, %v937_v0 }
 0x18b   : > { %1815 = vrot.lane.b32.xlu0 %v2587_v37, %s2671_s19  ;;  %v2558_v37 = vld [vmem:[%s2706_s17 + $0x69] sm:$0xf]  ;;  %v1098_v53 = vrot.slane %v1044_v18, 4 }
 0x18c   : > { %v819_v32 = vpop.permute.xlu2 %818  ;;  %v927_v63 = vpop.permute.xlu1 %926 }
 0x18d   : > { %v1039_v22 = vsel %vm556_vm2, %v1007_v11, %v927_v63  ;;  %v823_v27 = vpop.permute.xlu0 %822 }
 0x18e   : > { %1144 = vst [vmem:[#allocation1 + $0x31] ss:$2 sm:$0xff] %v1039_v22  ;;  %v1019_v39 = vsel %vm523_vm1, %v2398_v41, %v823_v27  ;;  %v2559_v27 = vld [vmem:[%s2706_s17 + $0x71] sm:$0xff]  ;;  %v171_v41 = vld [vmem:[%s2706_s17] sm:$0xff] }
 0x190   : > { %2478 = vmatmul.msk.f32.gmra.mxu0 %vm1185_vm3, %v3299_v15  ;;  %v1015_v15 = vsel %vm523_vm1, %v2394_v1, %v3275_v6 }
 0x192   : > { %1819 = vrot.lane.b32.xlu1 %v2589_v24, %s2671_s19  ;;  %1693 = vrot.lane.b32.xlu2 %v2558_v37, %s2670_s18  ;;  %v2396_v24 = vld [vmem:[%s2706_s17 + $0xd8] sm:$0xf] }
 0x193   : > { %1691 = vrot.lane.b32.xlu0 %v2557_v29, %s2670_s18  ;;  %v2591_v29 = vld [vmem:[%s2706_s17 + $0x72] sm:$0xff]  ;;  %v1017_v6 = vsel %vm523_vm1, %v2396_v24, %v819_v32 }
 0x194   : > { %v947_v0 = vpop.permute.xlu2 %946  ;;  %v951_v11 = vpop.permute.xlu1 %950 }
 0x195   : > { %v1148_v63 = vld.sshfl [vmem:[#allocation1 + $0x30] sm:$0xff pattern:$0x75316420]  ;;  %v1051_v9 = vsel %vm556_vm2, %v1019_v39, %v951_v11  ;;  %v943_v22 = vpop.permute.xlu0 %942  ;;  %v1049_v11 = vsel %vm556_vm2, %v1017_v6, %v947_v0 }
 0x196   : > { %1155 = vst [vmem:[#allocation1 + $0x30] ss:$2 sm:$0xff] %v1044_v18  ;;  %v1047_v37 = vsel %vm556_vm2, %v1015_v15, %v943_v22  ;;  %v524_v18 = vsel %vm523_vm1, %v171_v41, %v2865_v50  ;;  %v2592_v15 = vld [vmem:[%s2706_s17 + $0x7a] sm:$0xf]  ;;  %v2561_v50 = vld [vmem:[%s2706_s17 + $0x81] sm:$0xff]  ;;  %v3409_v0 = vld [vmem:[%s2706_s17 + $0xf0] sm:$0xff] }
 0x197   : > { %1156 = vst [vmem:[#allocation1 + $0x31] ss:$2 sm:$0xff] %v1098_v53  ;;  %v557_v39 = vsel %vm556_vm2, %v524_v18, %v2955_v30  ;;  %v2560_v22 = vld [vmem:[%s2706_s17 + $0x79] sm:$0xf]  ;;  %v2395_v30 = vld [vmem:[%s2706_s17 + $0xd0] sm:$0xff] }
 0x198   : > { %1174 = vst [vmem:[#allocation1 + $0x1] ss:$2 sm:$0xff] %v1051_v9  ;;  %2479 = vmatmul.msk.f32.gmra.mxu0 %vm1185_vm3, %v1148_v63  ;;  %v621_v9 = vrot.slane %v557_v39, 4  ;;  %v1159_v18 = vld.sshfl [vmem:[#allocation1 + $0x20] sm:$0xff pattern:$0x75316420] }
 0x199   : > { %1164 = vst [vmem:[#allocation1 + $0x11] ss:$2 sm:$0xff] %v1047_v37 }
 0x19a   : > { %1821 = vrot.lane.b32.xlu1 %v2590_v34, %s2671_s19  ;;  %1823 = vrot.lane.b32.xlu2 %v2591_v29, %s2671_s19 }
 0x19b   : > { %1695 = vrot.lane.b32.xlu0 %v2559_v27, %s2670_s18 }
 0x19c   : > { %v3390_v1 = vpop.permute.xlu2 %830  ;;  %v825_v53 = vpop.permute.xlu1 %824 }
 0x19d   : > { %v817_v32 = vpop.permute.xlu0 %816 }
 0x19e   : > { %v3395_v34 = vld.sshfl [vmem:[#allocation1 + $0x30] sm:$0xff pattern:$0x75316420]  ;;  %v1016_v27 = vsel %vm523_vm1, %v2395_v30, %v817_v32  ;;  %v2593_v32 = vld [vmem:[%s2706_s17 + $0x82] sm:$0xff] }
 0x19f   : > { %1168 = vst [vmem:[#allocation1 + $0x31] ss:$2 sm:$0xff] %v3325_v25  ;;  %v3399_v63 = vld.sshfl [vmem:[#allocation1] sm:$0xff pattern:$0x75316420]  ;;  %v1020_v25 = vsel %vm523_vm1, %v3409_v0, %v825_v53 }
 0x1a0   : > { %1167 = vst [vmem:[#allocation1 + $0x30] ss:$2 sm:$0xff] %v1049_v11  ;;  %2480 = vmatmul.msk.f32.gmra.mxu0 %vm1185_vm3, %v3262_v5  ;;  %v176_v5 = vld [vmem:[%s2706_s17 + $0x28] sm:$0xf] }
 0x1a1   : > { %1327 = vst [vmem:[#allocation1] ss:$2 sm:$0xff] %v557_v39  ;;  %v3417_v29 = vld.sshfl [vmem:[#allocation1 + $0x10] sm:$0xff pattern:$0x75316420] }
 0x1a2   : > { %1329 = vst [vmem:[#allocation1 + $0x1] ss:$2 sm:$0xff] %v621_v9  ;;  %1825 = vrot.lane.b32.xlu1 %v2592_v15, %s2671_s19  ;;  %1699 = vrot.lane.b32.xlu2 %v2561_v50, %s2670_s18  ;;  %v2562_v53 = vld [vmem:[%s2706_s17 + $0x89] sm:$0xf]  ;;  %v529_v50 = vsel %vm523_vm1, %v176_v5, %v2839_v40  ;;  %v2563_v9 = vld [vmem:[%s2706_s17 + $0x91] sm:$0xff] }
 0x1a3   : > { %1697 = vrot.lane.b32.xlu0 %v2560_v22, %s2670_s18  ;;  %v530_v22 = vsel %vm523_vm1, %v3207_v58, %v2898_v62  ;;  %v562_v30 = vsel %vm556_vm2, %v529_v50, %v3017_v23  ;;  %v172_v40 = vld [vmem:[%s2706_s17 + $0x8] sm:$0xf] }
 0x1a4   : > { %v3414_v24 = vpop.permute.xlu2 %479  ;;  %v953_v37 = vpop.permute.xlu1 %952  ;;  %v525_v5 = vsel %vm523_vm1, %v172_v40, %v2880_v56 }
 0x1a5   : > { %v1052_v41 = vsel %vm556_vm2, %v1020_v25, %v953_v37  ;;  %v945_v6 = vpop.permute.xlu0 %944  ;;  %v563_v37 = vsel %vm556_vm2, %v530_v22, %v2979_v51  ;;  %v534_v51 = vsel %vm523_vm1, %v3194_v42, %v2911_v4  ;;  %v2595_v42 = vld [vmem:[%s2706_s17 + $0x92] sm:$0xff] }
 0x1a6   : > { %v1102_v39 = vrot.slane %v1052_v41, 4  ;;  %1175 = vst [vmem:[#allocation1 + $0x10] ss:$2 sm:$0xff] %v1052_v41  ;;  %v1048_v11 = vsel %vm556_vm2, %v1016_v27, %v945_v6  ;;  %v3451_v27 = vsel %vm556_vm2, %v534_v51, %v3041_v45  ;;  %v526_v41 = vsel %vm523_vm1, %v3095_v3, %v2863_v49  ;;  %v2564_v51 = vld [vmem:[%s2706_s17 + $0x99] sm:$0xf] }
 0x1a7   : > { %v1100_v15 = vrot.slane %v1048_v11, 4  ;;  %1165 = vst [vmem:[#allocation1 + $0x20] ss:$2 sm:$0xff] %v1048_v11  ;;  %v558_v6 = vsel %vm556_vm2, %v525_v5, %v3007_v12  ;;  %v3464_v56 = vsel %vm556_vm2, %v526_v41, %v3005_v8  ;;  %v2567_v11 = vld [vmem:[%s2706_s17 + $0xb1] sm:$0xff]  ;;  %v626_v49 = vrot.slane %v3451_v27, 4  ;;  %v2401_v8 = vld [vmem:[%s2706_s17 + $0x100] sm:$0xff] }
 0x1a8   : > { %1176 = vst [vmem:[#allocation1 + $0x11] ss:$2 sm:$0xff] %v1102_v39  ;;  %2481 = vmatmul.msk.f32.gmra.mxu0 %vm1185_vm3, %v3321_v54  ;;  %v182_v54 = vld [vmem:[%s2706_s17 + $0x58] sm:$0xf]  ;;  %v2594_v39 = vld [vmem:[%s2706_s17 + $0x8a] sm:$0xf] }
 0x1a9   : > { %v1342_v25 = vld.sshfl [vmem:[#allocation1] sm:$0xff pattern:$0x75316420]  ;;  %1166 = vst [vmem:[#allocation1 + $0x21] ss:$2 sm:$0xff] %v1100_v15  ;;  %v535_v3 = vsel %vm523_vm1, %v182_v54, %v2861_v48  ;;  %v540_v54 = vsel %vm523_vm1, %v3245_v21, %v2934_v19  ;;  %v624_v5 = vrot.slane %v563_v37, 4 }
 0x1aa   : > { %1346 = vst [vmem:[#allocation1] ss:$2 sm:$0xff] %v562_v30  ;;  %2493 = vmatmul.msk.f32.vlgmr.msra.gmra.mxu1 %vm1185_vm3, %v1342_v25  ;;  %1701 = vrot.lane.b32.xlu1 %v2562_v53, %s2670_s18  ;;  %v2400_v15 = vld [vmem:[%s2706_s17 + $0xf8] sm:$0xf]  ;;  %v2402_v25 = vld [vmem:[%s2706_s17 + $0x108] sm:$0xf] }
 0x1ab   : > { %1347 = vst [vmem:[#allocation1 + $0x1] ss:$2 sm:$0xff] %v563_v37  ;;  %1827 = vrot.lane.b32.xlu0 %v2593_v32, %s2671_s19  ;;  %1703 = vrot.lane.b32.xlu2 %v2563_v9, %s2670_s18  ;;  %v178_v48 = vld [vmem:[%s2706_s17 + $0x38] sm:$0xf]  ;;  %v536_v37 = vsel %vm523_vm1, %v3144_v28, %v2924_v13 }
 0x1ac   : > { %v3441_v62 = vpop.permute.xlu2 %1675  ;;  %v829_v23 = vpop.permute.xlu1 %828  ;;  %v1172_v30 = vld.sshfl [vmem:[#allocation1 + $0x30] sm:$0xff pattern:$0x75316420]  ;;  %v2011_v13 = vld [vmem:[%s4071_s1 + $0x18] sm:$0xff] }
 0x1ad   : > { %v827_v58 = vpop.permute.xlu0 %826  ;;  %v1022_v50 = vsel %vm523_vm1, %v2401_v8, %v829_v23  ;;  %v531_v23 = vsel %vm523_vm1, %v178_v48, %v2896_v61  ;;  %v2600_v8 = vld [vmem:[%s2706_s17 + $0xba] sm:$0xf] }
 0x1ae   : > { %v1021_v32 = vsel %vm523_vm1, %v2400_v15, %v827_v58  ;;  %v573_v58 = vsel %vm556_vm2, %v540_v54, %v3073_v7  ;;  %v1023_v7 = vsel %vm523_vm1, %v2402_v25, %v3390_v1  ;;  %v2597_v54 = vld [vmem:[%s2706_s17 + $0xa2] sm:$0xff] }
 0x1af   : > { %v3458_v4 = vld.sshfl [vmem:[#allocation1 + $0x10] sm:$0xff pattern:$0x75316420]  ;;  %v629_v61 = vrot.slane %v573_v58, 4 }
 0x1b0   : > { %1331 = vst [vmem:[#allocation1 + $0x10] ss:$2 sm:$0xff] %v558_v6  ;;  %v1171_v45 = vld.sshfl [vmem:[#allocation1 + $0x20] sm:$0xff pattern:$0x75316420]  ;;  %2482 = vmatmul.msk.f32.gmra.mxu0 %vm1185_vm3, %v1159_v18  ;;  %v568_v18 = vsel %vm556_vm2, %v535_v3, %v3039_v16 }
 0x1b1   : > { %1333 = vst [vmem:[#allocation1 + $0x11] ss:$2 sm:$0xff] %v3464_v56  ;;  %2486 = vmatmul.msk.f32.vlgmr.msra.gmra.mxu3 %vm1185_vm3, %v1171_v45  ;;  %v2568_v6 = vld [vmem:[%s2706_s17 + $0xb9] sm:$0xf] }
 0x1b2   : > { %v3473_v12 = vld.sshfl [vmem:[#allocation1] sm:$0xff pattern:$0x75316420]  ;;  %1831 = vrot.lane.b32.xlu1 %v2595_v42, %s2671_s19 }
 0x1b3   : > { %1358 = vst [vmem:[#allocation1] ss:$2 sm:$0xff] %v626_v49  ;;  %1829 = vrot.lane.b32.xlu0 %v2594_v39, %s2671_s19  ;;  %1711 = vrot.lane.b32.xlu2 %v2567_v11, %s2670_s18  ;;  %v564_v39 = vsel %vm556_vm2, %v531_v23, %v3031_v35  ;;  %v174_v35 = vld [vmem:[%s2706_s17 + $0x18] sm:$0xf]  ;;  %v569_v11 = vsel %vm556_vm2, %v536_v37, %v3003_v10  ;;  %v622_v49 = vrot.slane %v3464_v56, 4 }
 0x1b4   : > { %1359 = vst [vmem:[#allocation1 + $0x1] ss:$2 sm:$0xff] %v568_v18  ;;  %v3482_v53 = vpop.permute.xlu2 %1803  ;;  %v957_v9 = vpop.permute.xlu1 %956  ;;  %v527_v28 = vsel %vm523_vm1, %v174_v35, %v2878_v55  ;;  %v2596_v56 = vld [vmem:[%s2706_s17 + $0x9a] sm:$0xf]  ;;  %v2565_v18 = vld [vmem:[%s2706_s17 + $0xa1] sm:$0xff]  ;;  %v627_v48 = vrot.slane %v569_v11, 4  ;;  %v528_v55 = vsel %vm523_vm1, %v3122_v46, %v2825_v36 }
 0x1b5   : > { %v955_v22 = vpop.permute.xlu0 %954  ;;  %v1054_v16 = vsel %vm556_vm2, %v1022_v50, %v957_v9  ;;  %v560_v10 = vsel %vm556_vm2, %v527_v28, %v2967_v14  ;;  %v532_v14 = vsel %vm523_vm1, %v3141_v26, %v2850_v44  ;;  %v197_v26 = vld [vmem:[%s2706_s17 + $0xd0] sm:$0xff] }
 0x1b6   : > { %v1053_v40 = vsel %vm556_vm2, %v1021_v32, %v955_v22  ;;  %v1103_v41 = vrot.slane %v1054_v16, 4  ;;  %1178 = vst [vmem:[#allocation1 + $0x21] ss:$2 sm:$0xff] %v1054_v16  ;;  %v561_v32 = vsel %vm556_vm2, %v528_v55, %v3019_v20  ;;  %v565_v44 = vsel %vm556_vm2, %v532_v14, %v3029_v52  ;;  %v188_v20 = vld [vmem:[%s2706_s17 + $0x88] sm:$0xf] }
 0x1b7   : > { %1177 = vst [vmem:[#allocation1 + $0x20] ss:$2 sm:$0xff] %v1053_v40  ;;  %v198_v22 = vld [vmem:[%s2706_s17 + $0xd8] sm:$0xf]  ;;  %v625_v25 = vrot.slane %v565_v44, 4  ;;  %v2569_v16 = vld [vmem:[%s2706_s17 + $0xc1] sm:$0xff]  ;;  %v550_v40 = vsel %vm523_vm1, %v197_v26, %v2932_v17 }
 0x1b8   : > { %v1343_v42 = vld.sshfl [vmem:[#allocation1 + $0x10] sm:$0xff pattern:$0x75316420]  ;;  %2483 = vmatmul.msk.f32.gmra.mxu0 %vm1185_vm3, %v3395_v34  ;;  %1179 = vst [vmem:[#allocation1 + $0x30] ss:$2 sm:$0xff] %v1103_v41  ;;  %v3593_v41 = vsel %vm556_vm2, %v550_v40, %v3414_v24  ;;  %v4103_v17 = vld [vmem:[#allocation10_spill] sm:$0xff] }
 0x1b9   : > { %1348 = vst [vmem:[#allocation1 + $0x10] ss:$2 sm:$0xff] %v624_v5  ;;  %2487 = vmatmul.msk.f32.gmra.mxu3 %vm1185_vm3, %v1172_v30  ;;  %2494 = vmatmul.msk.f32.gmra.mxu1 %vm1185_vm3, %v1343_v42  ;;  %v2012_v34 = vld [vmem:[%s4071_s1 + $0x20] sm:$0xf]  ;;  %v623_v30 = vrot.slane %v561_v32, 4  ;;  %v541_v5 = vsel %vm523_vm1, %v188_v20, %v2894_v60  ;;  %v4105_v24 = vld [vmem:[#allocation14_spill] sm:$0xff] }
 0x1ba   : > { %1349 = vst [vmem:[#allocation1 + $0x11] ss:$2 sm:$0xff] %v564_v39  ;;  %1705 = vrot.lane.b32.xlu1 %v2564_v51, %s2670_s18  ;;  %2613 = vmatpush.msk.msra.mxu2 %vm1234_vm0, %v2012_v34  ;;  %v180_v60 = vld [vmem:[%s2706_s17 + $0x48] sm:$0xf]  ;;  %v551_v42 = vsel %vm523_vm1, %v198_v22, %v4105_v24  ;;  %v4106_v39 = vld [vmem:[#allocation19_spill] sm:$0xff] }
 0x1bb   : > { %v3506_v19 = vld.sshfl [vmem:[#allocation1] sm:$0xff pattern:$0x75316420]  ;;  %1839 = vrot.lane.b32.xlu0 %v3132_v47, %s2671_s19  ;;  %1713 = vrot.lane.b32.xlu2 %v2568_v6, %s2670_s18  ;;  %v192_v47 = vld [vmem:[%s2706_s17 + $0xa8] sm:$0xf]  ;;  %v542_v6 = vsel %vm523_vm1, %v3221_v57, %v4103_v17  ;;  %v4114_v17 = vld [vmem:[#allocation7_spill] sm:$0xff] }
 0x1bc   : > { %1370 = vst [vmem:[#allocation1] ss:$2 sm:$0xff] %v573_v58  ;;  %v3514_v21 = vpop.permute.xlu2 %477  ;;  %v472_v1 = vpop.permute.xlu1 %471  ;;  %2644 = vmatpush.msk.msra.mxu3 %vm1234_vm0, %v2012_v34  ;;  %2158 = vmatpush.msra.mxu2 %v2011_v13  ;;  %v2517_v57 = vld [vmem:[%s2706_s17 + $0x20] sm:$0xff]  ;;  %v184_v34 = vld [vmem:[%s2706_s17 + $0x68] sm:$0xf] }
 0x1bd   : > { %1371 = vst [vmem:[#allocation1 + $0x1] ss:$2 sm:$0xff] %v629_v61  ;;  %v959_v45 = vpop.permute.xlu0 %958  ;;  %v634_v61 = vrot.slane %v3593_v41, 4  ;;  %v2566_v55 = vld [vmem:[%s2706_s17 + $0xa9] sm:$0xf] }
 0x1be   : > { %v1055_v3 = vsel %vm556_vm2, %v1023_v7, %v959_v45  ;;  %v3535_v15 = vld.sshfl [vmem:[#allocation1 + $0x20] sm:$0xff pattern:$0x75316420]  ;;  %2645 = vmatpush.msra.mxu3 %v2011_v13  ;;  %v4110_v14 = vld [vmem:[#allocation2_spill] sm:$0xff]  ;;  %v186_v22 = vld [vmem:[%s2706_s17 + $0x78] sm:$0xf] }
 0x1bf   : > { %1180 = vst [vmem:[#allocation1 + $0x31] ss:$2 sm:$0xff] %v1055_v3  ;;  %v1899_v3 = vsel %vm523_vm1, %v2517_v57, %v3441_v62  ;;  %v4117_v24 = vld [vmem:[#allocation18_spill] sm:$0xff] }
 0x1c0   : > { %1335 = vst [vmem:[#allocation1 + $0x20] ss:$2 sm:$0xff] %v622_v49  ;;  %2484 = vmatmul.msk.f32.gmra.mxu0 %vm1185_vm3, %v3336_v59  ;;  %v546_v59 = vsel %vm523_vm1, %v3355_v43, %v2957_v31  ;;  %v194_v49 = vld [vmem:[%s2706_s17 + $0xb8] sm:$0xf] }
 0x1c1   : > { %v3543_v50 = vld.sshfl [vmem:[#allocation1 + $0x10] sm:$0xff pattern:$0x75316420]  ;;  %1337 = vst [vmem:[#allocation1 + $0x21] ss:$2 sm:$0xff] %v560_v10  ;;  %2488 = vmatmul.msk.f32.gmra.mxu3 %vm1185_vm3, %v3399_v63  ;;  %v545_v63 = vsel %vm523_vm1, %v192_v47, %v2959_v33  ;;  %v3562_v36 = vsel %vm556_vm2, %v546_v59, %v472_v1  ;;  %v4107_v47 = vld [vmem:[#allocation4_spill] sm:$0xff]  ;;  %v538_v59 = vsel %vm523_vm1, %v3225_v2, %v4110_v14 }
 0x1c2   : > { %1360 = vst [vmem:[#allocation1 + $0x10] ss:$2 sm:$0xff] %v569_v11  ;;  %1841 = vrot.lane.b32.xlu1 %v2600_v8, %s2671_s19  ;;  %v578_v31 = vsel %vm556_vm2, %v545_v63, %v3102_v38  ;;  %v2573_v38 = vld [vmem:[%s2706_s17 + $0xe1] sm:$0xff]  ;;  %v533_v11 = vsel %vm523_vm1, %v180_v60, %v4107_v47  ;;  %v4108_v8 = vld [vmem:[#allocation15_spill] sm:$0xff]  ;;  %v632_v20 = vrot.slane %v3562_v36, 4  ;;  %v4119_v47 = vld [vmem:[#allocation24_spill] sm:$0xff] }
 0x1c3   : > { %1361 = vst [vmem:[#allocation1 + $0x11] ss:$2 sm:$0xff] %v627_v48  ;;  %1833 = vrot.lane.b32.xlu0 %v2596_v56, %s2671_s19  ;;  %1707 = vrot.lane.b32.xlu2 %v2565_v18, %s2670_s18  ;;  %v566_v13 = vsel %vm556_vm2, %v533_v11, %v4108_v8  ;;  %v2605_v10 = vld [vmem:[%s2706_s17 + $0xe2] sm:$0xff]  ;;  %v4122_v8 = vld [vmem:[#allocation23_spill] sm:$0xff] }
 0x1c4   : > { %v3570_v33 = vld.sshfl [vmem:[#allocation1] sm:$0xff pattern:$0x75316420]  ;;  %v3572_v46 = vpop.permute.xlu2 %1805  ;;  %v482_v43 = vpop.permute.xlu1 %481  ;;  %v4109_v56 = vld [vmem:[#allocation6_spill] sm:$0xff] }
 0x1c5   : > { %1382 = vst [vmem:[#allocation1] ss:$2 sm:$0xff] %v578_v31  ;;  %v3576_v9 = vpop.permute.xlu0 %473  ;;  %v584_v7 = vsel %vm556_vm2, %v551_v42, %v482_v43  ;;  %v537_v18 = vsel %vm523_vm1, %v184_v34, %v4109_v56  ;;  %v2601_v48 = vld [vmem:[%s2706_s17 + $0xc2] sm:$0xff]  ;;  %v4112_v31 = vld [vmem:[#allocation20_spill] sm:$0xff] }
 0x1c6   : > { %1383 = vst [vmem:[#allocation1 + $0x1] ss:$2 sm:$0xff] %v3562_v36  ;;  %v3580_v52 = vld.sshfl [vmem:[#allocation1 + $0x30] sm:$0xff pattern:$0x75316420]  ;;  %v4111_v63 = vld [vmem:[#allocation21_spill] sm:$0xff]  ;;  %v571_v2 = vsel %vm556_vm2, %v538_v59, %v4112_v31 }
 0x1c7   : > { %1339 = vst [vmem:[#allocation1 + $0x30] ss:$2 sm:$0xff] %v561_v32  ;;  %v570_v62 = vsel %vm556_vm2, %v537_v18, %v4111_v63  ;;  %v1931_v32 = vsel %vm556_vm2, %v1899_v3, %v3482_v53  ;;  %v4113_v53 = vld [vmem:[#allocation5_spill] sm:$0xff]  ;;  %v2518_v56 = vld [vmem:[%s2706_s17 + $0x28] sm:$0xf]  ;;  %v4123_v18 = vld [vmem:[#allocation12_spill] sm:$0xff] }
 0x1c8   : > { %v1344_v51 = vld.sshfl [vmem:[#allocation1 + $0x20] sm:$0xff pattern:$0x75316420]  ;;  %1341 = vst [vmem:[#allocation1 + $0x31] ss:$2 sm:$0xff] %v623_v30  ;;  %2485 = vmatmul.msk.f32.gmra.mxu0 %vm1185_vm3, %v3417_v29  ;;  %v4104_v29 = vld [vmem:[#allocation22_spill] sm:$0xff]  ;;  %v547_v26 = vsel %vm523_vm1, %v194_v49, %v4113_v53 }
 0x1c9   : > { %1350 = vst [vmem:[#allocation1 + $0x20] ss:$2 sm:$0xff] %v565_v44  ;;  %2495 = vmatmul.msk.f32.gmra.mxu1 %vm1185_vm3, %v1344_v51  ;;  %2489 = vmatmul.msk.f32.gmra.mxu3 %vm1185_vm3, %v3458_v4  ;;  %v574_v23 = vsel %vm556_vm2, %v541_v5, %v4104_v29  ;;  %v3611_v4 = vsel %vm556_vm2, %v542_v6, %v4106_v39  ;;  %v190_v30 = vld [vmem:[%s2706_s17 + $0x98] sm:$0xf]  ;;  %v2574_v5 = vld [vmem:[%s2706_s17 + $0xe9] sm:$0xf] }
 0x1ca   : > { %v3603_v58 = vld.sshfl [vmem:[#allocation1 + $0x10] sm:$0xff pattern:$0x75316420]  ;;  %1351 = vst [vmem:[#allocation1 + $0x21] ss:$2 sm:$0xff] %v625_v25  ;;  %1723 = vrot.lane.b32.xlu1 %v2573_v38, %s2670_s18  ;;  %v580_v43 = vsel %vm556_vm2, %v547_v26, %v3576_v9  ;;  %v539_v6 = vsel %vm523_vm1, %v186_v22, %v4114_v17  ;;  %v4115_v29 = vld [vmem:[#allocation13_spill] sm:$0xff] }
 0x1cb   : > { %1372 = vst [vmem:[#allocation1 + $0x10] ss:$2 sm:$0xff] %v574_v23  ;;  %1715 = vrot.lane.b32.xlu0 %v2569_v16, %s2670_s18  ;;  %1835 = vrot.lane.b32.xlu2 %v2597_v54, %s2671_s19  ;;  %v628_v16 = vrot.slane %v571_v2, 4  ;;  %v2571_v51 = vld [vmem:[%s2706_s17 + $0xd1] sm:$0xff]  ;;  %v2570_v54 = vld [vmem:[%s2706_s17 + $0xc9] sm:$0xf]  ;;  %v572_v42 = vsel %vm556_vm2, %v539_v6, %v4117_v24 }
 0x1cc   : > { %1373 = vst [vmem:[#allocation1 + $0x11] ss:$2 sm:$0xff] %v3611_v4  ;;  %v3619_v35 = vpop.permute.xlu2 %489  ;;  %v484_v1 = vpop.permute.xlu1 %483  ;;  %v4116_v9 = vld [vmem:[#allocation27_spill] sm:$0xff]  ;;  %v630_v39 = vrot.slane %v3611_v4, 4  ;;  %v2598_v59 = vld [vmem:[%s2706_s17 + $0xaa] sm:$0xf] }
 0x1cd   : > { %v3622_v37 = vld.sshfl [vmem:[#allocation1] sm:$0xff pattern:$0x75316420]  ;;  %v3624_v45 = vpop.permute.xlu0 %475  ;;  %v552_v23 = vsel %vm523_vm1, %v4116_v9, %v4115_v29  ;;  %v2602_v31 = vld [vmem:[%s2706_s17 + $0xca] sm:$0xf]  ;;  %v4125_v6 = vld [vmem:[#allocation11_spill] sm:$0xff] }
 0x1ce   : > { %1394 = vst [vmem:[#allocation1] ss:$2 sm:$0xff] %v634_v61  ;;  %v585_v57 = vsel %vm556_vm2, %v552_v23, %v484_v1  ;;  %v4118_v61 = vld [vmem:[#allocation9_spill] sm:$0xff]  ;;  %v200_v17 = vld [vmem:[%s2706_s17 + $0xe8] sm:$0xf]  ;;  %v2659_v24 = vld [vmem:[%s2706_s17 + $0xd2] sm:$0xff] }
 0x1cf   : > { %v1345_v28 = vld.sshfl [vmem:[#allocation1 + $0x30] sm:$0xff pattern:$0x75316420]  ;;  %1395 = vst [vmem:[#allocation1 + $0x1] ss:$2 sm:$0xff] %v584_v7  ;;  %v543_v7 = vsel %vm523_vm1, %v190_v30, %v4118_v61  ;;  %v635_v49 = vrot.slane %v585_v57, 4 }
 0x1d0   : > { %1352 = vst [vmem:[#allocation1 + $0x30] ss:$2 sm:$0xff] %v566_v13  ;;  %v576_v4 = vsel %vm556_vm2, %v543_v7, %v4119_v47  ;;  %v4126_v9 = vld [vmem:[#allocation17_spill] sm:$0xff] }
 0x1d1   : > { %v3645_v44 = vld.sshfl [vmem:[#allocation1 + $0x20] sm:$0xff pattern:$0x75316420]  ;;  %1353 = vst [vmem:[#allocation1 + $0x31] ss:$2 sm:$0xff] %v3451_v27  ;;  %2496 = vmatmul.msk.f32.gmra.mxu1 %vm1185_vm3, %v1345_v28  ;;  %2490 = vmatmul.msk.f32.gmra.mxu3 %vm1185_vm3, %v3535_v15  ;;  %v1995_v15 = vrot.slane %v1931_v32, 4  ;;  %v554_v23 = vsel %vm523_vm1, %v3409_v0, %v4126_v9 }
 0x1d2   : > { %1362 = vst [vmem:[#allocation1 + $0x20] ss:$2 sm:$0xff] %v570_v62  ;;  %1851 = vrot.lane.b32.xlu1 %v2605_v10, %s2671_s19  ;;  %v2578_v9 = vld [vmem:[%s2706_s17 + $0x109] sm:$0xf] }
 0x1d3   : > { %1363 = vst [vmem:[#allocation1 + $0x21] ss:$2 sm:$0xff] %v571_v2  ;;  %v3657_v27 = vld.sshfl [vmem:[#allocation1 + $0x10] sm:$0xff pattern:$0x75316420]  ;;  %1843 = vrot.lane.b32.xlu0 %v2601_v48, %s2671_s19  ;;  %1709 = vrot.lane.b32.xlu2 %v2566_v55, %s2670_s18  ;;  %v4124_v48 = vld [vmem:[#allocation26_spill] sm:$0xff] }
 0x1d4   : > { %1384 = vst [vmem:[#allocation1 + $0x10] ss:$2 sm:$0xff] %v632_v20  ;;  %v3663_v36 = vpop.permute.xlu2 %1811  ;;  %v1680_v25 = vpop.permute.xlu1 %1679  ;;  %v548_v55 = vsel %vm523_vm1, %v4124_v48, %v4123_v18  ;;  %v2519_v20 = vld [vmem:[%s2706_s17 + $0x30] sm:$0xff]  ;;  %v2522_v48 = vld [vmem:[%s2706_s17 + $0x48] sm:$0xf] }
 0x1d5   : > { %1385 = vst [vmem:[#allocation1 + $0x11] ss:$2 sm:$0xff] %v580_v43  ;;  %v1678_v38 = vpop.permute.xlu0 %1677  ;;  %v581_v62 = vsel %vm556_vm2, %v548_v55, %v3624_v45  ;;  %v1901_v43 = vsel %vm523_vm1, %v2519_v20, %v1680_v25 }
 0x1d6   : > { %v3667_v40 = vld.sshfl [vmem:[#allocation1] sm:$0xff pattern:$0x75316420]  ;;  %v1900_v53 = vsel %vm523_vm1, %v2518_v56, %v1678_v38  ;;  %v633_v26 = vrot.slane %v581_v62, 4 }
 0x1d7   : > { %2013 = vst [vmem:[#allocation1] ss:$2 sm:$0xff] %v1931_v32  ;;  %v2575_v32 = vld [vmem:[%s2706_s17 + $0xf1] sm:$0xff]  ;;  %v1932_v22 = vsel %vm556_vm2, %v1900_v53, %v3572_v46  ;;  %v2577_v53 = vld [vmem:[%s2706_s17 + $0x101] sm:$0xff] }
 0x1d8   : > { %v3677_v60 = vld.sshfl [vmem:[#allocation1 + $0x30] sm:$0xff pattern:$0x75316420]  ;;  %2015 = vst [vmem:[#allocation1 + $0x1] ss:$2 sm:$0xff] %v1995_v15 }
 0x1d9   : > { %1364 = vst [vmem:[#allocation1 + $0x30] ss:$2 sm:$0xff] %v628_v16  ;;  %2497 = vmatmul.msk.f32.gmra.mxu1 %vm1185_vm3, %v3473_v12  ;;  %2491 = vmatmul.msk.f32.gmra.mxu3 %vm1185_vm3, %v3580_v52  ;;  %v4120_v12 = vld [vmem:[#allocation3_spill] sm:$0xff]  ;;  %v4121_v52 = vld [vmem:[#allocation25_spill] sm:$0xff]  ;;  %v196_v16 = vld [vmem:[%s2706_s17 + $0xc8] sm:$0xf] }
 0x1da   : > { %v3689_v34 = vld.sshfl [vmem:[#allocation1 + $0x20] sm:$0xff pattern:$0x75316420]  ;;  %1365 = vst [vmem:[#allocation1 + $0x31] ss:$2 sm:$0xff] %v572_v42  ;;  %1719 = vrot.lane.b32.xlu1 %v2571_v51, %s2670_s18  ;;  %v544_v1 = vsel %vm523_vm1, %v4121_v52, %v4120_v12  ;;  %v549_v29 = vsel %vm523_vm1, %v196_v16, %v4125_v6 }
 0x1db   : > { %1374 = vst [vmem:[#allocation1 + $0x20] ss:$2 sm:$0xff] %v630_v39  ;;  %1717 = vrot.lane.b32.xlu0 %v2570_v54, %s2670_s18  ;;  %1725 = vrot.lane.b32.xlu2 %v2574_v5, %s2670_s18  ;;  %v577_v13 = vsel %vm556_vm2, %v544_v1, %v4122_v8  ;;  %v2606_v54 = vld [vmem:[%s2706_s17 + $0xea] sm:$0xf]  ;;  %v2607_v5 = vld [vmem:[%s2706_s17 + $0xf2] sm:$0xff]  ;;  %v582_v46 = vsel %vm556_vm2, %v549_v29, %v3514_v21 }
 0x1dc   : > { %1375 = vst [vmem:[#allocation1 + $0x21] ss:$2 sm:$0xff] %v576_v4  ;;  %v3699_v11 = vld.sshfl [vmem:[#allocation1 + $0x10] sm:$0xff pattern:$0x75316420]  ;;  %v3701_v3 = vpop.permute.xlu2 %1813  ;;  %v488_v28 = vpop.permute.xlu1 %487  ;;  %v631_v63 = vrot.slane %v577_v13, 4 }
 0x1dd   : > { %1396 = vst [vmem:[#allocation1 + $0x10] ss:$2 sm:$0xff] %v585_v57  ;;  %v486_v10 = vpop.permute.xlu0 %485  ;;  %v587_v0 = vsel %vm556_vm2, %v554_v23, %v488_v28  ;;  %v202_v4 = vld [vmem:[%s2706_s17 + $0xf8] sm:$0xf]  ;;  %v2525_v23 = vld [vmem:[%s2706_s17 + $0x60] sm:$0xff] }
 0x1de   : > { %1397 = vst [vmem:[#allocation1 + $0x11] ss:$2 sm:$0xff] %v635_v49  ;;  %v2520_v12 = vld [vmem:[%s2706_s17 + $0x38] sm:$0xf]  ;;  %v2521_v49 = vld [vmem:[%s2706_s17 + $0x40] sm:$0xff]  ;;  %v636_v56 = vrot.slane %v587_v0, 4 }
 0x1df   : > { %v2028_v14 = vld.sshfl [vmem:[#allocation1] sm:$0xff pattern:$0x75316420]  ;;  %v2572_v52 = vld [vmem:[%s2706_s17 + $0xd9] sm:$0xf] }
 0x1e0   : > { %2614 = vmatmul.msk.f32.vlgmr.msra.gmra.mxu2 %vm1185_vm3, %v2028_v14  ;;  %v2604_v1 = vld [vmem:[%s2706_s17 + $0xda] sm:$0xf] }
 0x1e1   : > { %v3715_v2 = vld.sshfl [vmem:[#allocation1 + $0x30] sm:$0xff pattern:$0x75316420]  ;;  %2498 = vmatmul.msk.f32.gmra.mxu1 %vm1185_vm3, %v3543_v50  ;;  %v4128_v8 = vld [vmem:[#allocation16_spill] sm:$0xff] }
 0x1e2   : > { %1377 = vst [vmem:[#allocation1 + $0x31] ss:$2 sm:$0xff] %v631_v63  ;;  %1837 = vrot.lane.b32.xlu1 %v2598_v59, %s2671_s19 }
 0x1e3   : > { %1376 = vst [vmem:[#allocation1 + $0x30] ss:$2 sm:$0xff] %v577_v13  ;;  %v3722_v45 = vld.sshfl [vmem:[#allocation1 + $0x20] sm:$0xff pattern:$0x75316420]  ;;  %1727 = vrot.lane.b32.xlu0 %v2575_v32, %s2670_s18  ;;  %1845 = vrot.lane.b32.xlu2 %v2602_v31, %s2671_s19  ;;  %v555_v13 = vsel %vm523_vm1, %v202_v4, %v4128_v8  ;;  %v2527_v4 = vld [vmem:[%s2706_s17 + $0x70] sm:$0xff] }
 0x1e4   : > { %1386 = vst [vmem:[#allocation1 + $0x20] ss:$2 sm:$0xff] %v581_v62  ;;  %v3726_v50 = vpop.permute.xlu2 %1817  ;;  %v1682_v30 = vpop.permute.xlu1 %1681  ;;  %v588_v28 = vsel %vm556_vm2, %v555_v13, %v3619_v35  ;;  %v2528_v13 = vld [vmem:[%s2706_s17 + $0x78] sm:$0xf] }
 0x1e5   : > { %v3728_v15 = vld.sshfl [vmem:[#allocation1 + $0x10] sm:$0xff pattern:$0x75316420]  ;;  %1387 = vst [vmem:[#allocation1 + $0x21] ss:$2 sm:$0xff] %v633_v26  ;;  %v1808_v38 = vpop.permute.xlu0 %1807  ;;  %v1902_v18 = vsel %vm523_vm1, %v2520_v12, %v1682_v30 }
 0x1e6   : > { %2017 = vst [vmem:[#allocation1 + $0x10] ss:$2 sm:$0xff] %v1932_v22  ;;  %v1933_v51 = vsel %vm556_vm2, %v1901_v43, %v1808_v38  ;;  %v2608_v26 = vld [vmem:[%s2706_s17 + $0xfa] sm:$0xf]  ;;  %v2609_v43 = vld [vmem:[%s2706_s17 + $0x102] sm:$0xff]  ;;  %v2523_v30 = vld [vmem:[%s2706_s17 + $0x50] sm:$0xff] }
 0x1e7   : > { %2019 = vst [vmem:[#allocation1 + $0x11] ss:$2 sm:$0xff] %v1933_v51  ;;  %v2524_v38 = vld [vmem:[%s2706_s17 + $0x58] sm:$0xf] }
 0x1e9   : > { %2499 = vmatmul.msk.f32.gmra.mxu1 %vm1185_vm3, %v3645_v44  ;;  %v4127_v44 = vld [vmem:[#allocation8_spill] sm:$0xff] }
 0x1ea   : > { %v3744_v25 = vld.sshfl [vmem:[#allocation1 + $0x30] sm:$0xff pattern:$0x75316420]  ;;  %1853 = vrot.lane.b32.xlu1 %v2606_v54, %s2671_s19  ;;  %v553_v21 = vsel %vm523_vm1, %v200_v17, %v4127_v44 }
 0x1eb   : > { %1388 = vst [vmem:[#allocation1 + $0x30] ss:$2 sm:$0xff] %v582_v46  ;;  %1847 = vrot.lane.b32.xlu0 %v2659_v24, %s2671_s19  ;;  %1855 = vrot.lane.b32.xlu2 %v2607_v5, %s2671_s19  ;;  %v586_v57 = vsel %vm556_vm2, %v553_v21, %v486_v10  ;;  %v2579_v46 = vld [vmem:[%s2706_s17 + $0x111] sm:$0xff] }
 0x1ec   : > { %1389 = vst [vmem:[#allocation1 + $0x31] ss:$2 sm:$0xff] %v3593_v41  ;;  %v1392_v42 = vld.sshfl [vmem:[#allocation1 + $0x20] sm:$0xff pattern:$0x75316420]  ;;  %v3757_v39 = vpop.permute.xlu2 %1693  ;;  %v1684_v61 = vpop.permute.xlu1 %1683 }
 0x1ed   : > { %1399 = vst [vmem:[#allocation1 + $0x21] ss:$2 sm:$0xff] %v587_v0  ;;  %2511 = vmatmul.msk.f32.vlgmr.msrb.gmra.mxu3 %vm1185_vm3, %v1392_v42  ;;  %v1810_v7 = vpop.permute.xlu0 %1809  ;;  %v2576_v41 = vld [vmem:[%s2706_s17 + $0xf9] sm:$0xf]  ;;  %v1903_v55 = vsel %vm523_vm1, %v2521_v49, %v1684_v61 }
 0x1ee   : > { %1398 = vst [vmem:[#allocation1 + $0x20] ss:$2 sm:$0xff] %v586_v57  ;;  %v2029_v47 = vld.sshfl [vmem:[#allocation1 + $0x10] sm:$0xff pattern:$0x75316420]  ;;  %v1934_v14 = vsel %vm556_vm2, %v1902_v18, %v1810_v7  ;;  %v1935_v31 = vsel %vm556_vm2, %v1903_v55, %v3663_v36  ;;  %v2529_v55 = vld [vmem:[%s2706_s17 + $0x80] sm:$0xff] }
 0x1ef   : > { %2615 = vmatmul.msk.f32.gmra.mxu2 %vm1185_vm3, %v2029_v47  ;;  %v1997_v22 = vrot.slane %v1935_v31, 4  ;;  %v2580_v0 = vld [vmem:[%s2706_s17 + $0x119] sm:$0xf]  ;;  %v2526_v57 = vld [vmem:[%s2706_s17 + $0x68] sm:$0xf] }
 0x1f0   : > { %v2611_v7 = vld [vmem:[%s2706_s17 + $0x112] sm:$0xff]  ;;  %v1908_v47 = vsel %vm523_vm1, %v2526_v57, %v3757_v39 }
 0x1f1   : > { %2500 = vmatmul.msk.f32.gmra.mxu1 %vm1185_vm3, %v3677_v60  ;;  %v1996_v60 = vrot.slane %v1933_v51, 4 }
 0x1f2   : > { %1729 = vrot.lane.b32.xlu1 %v2576_v41, %s2670_s18 }
 0x1f3   : > { %v1393_v10 = vld.sshfl [vmem:[#allocation1 + $0x30] sm:$0xff pattern:$0x75316420]  ;;  %1721 = vrot.lane.b32.xlu0 %v2572_v52, %s2670_s18  ;;  %1849 = vrot.lane.b32.xlu2 %v2604_v1, %s2671_s19 }
 0x1f4   : > { %1401 = vst [vmem:[#allocation1 + $0x31] ss:$2 sm:$0xff] %v588_v28  ;;  %v3781_v59 = vpop.permute.xlu2 %1823  ;;  %v1688_v63 = vpop.permute.xlu1 %1687 }
 0x1f5   : > { %1400 = vst [vmem:[#allocation1 + $0x30] ss:$2 sm:$0xff] %v636_v56  ;;  %v3783_v35 = vld.sshfl [vmem:[#allocation1 + $0x20] sm:$0xff pattern:$0x75316420]  ;;  %2512 = vmatmul.msk.f32.gmra.mxu3 %vm1185_vm3, %v1393_v10  ;;  %v1686_v62 = vpop.permute.xlu0 %1685 }
 0x1f6   : > { %2021 = vst [vmem:[#allocation1 + $0x20] ss:$2 sm:$0xff] %v1996_v60  ;;  %v1904_v32 = vsel %vm523_vm1, %v2522_v48, %v1686_v62 }
 0x1f7   : > { %2023 = vst [vmem:[#allocation1 + $0x21] ss:$2 sm:$0xff] %v1934_v14  ;;  %v1936_v20 = vsel %vm556_vm2, %v1904_v32, %v3701_v3  ;;  %v1905_v3 = vsel %vm523_vm1, %v2523_v30, %v1688_v63 }
 0x1f8   : > { %2032 = vst [vmem:[#allocation1] ss:$2 sm:$0xff] %v1936_v20  ;;  %v2530_v20 = vld [vmem:[%s2706_s17 + $0x88] sm:$0xf] }
 0x1f9   : > { %2501 = vmatmul.msk.f32.gmra.mxu1 %vm1185_vm3, %v3506_v19 }
 0x1fa   : > { %1731 = vrot.lane.b32.xlu1 %v2577_v53, %s2670_s18 }
 0x1fb   : > { %1857 = vrot.lane.b32.xlu0 %v2608_v26, %s2671_s19  ;;  %1859 = vrot.lane.b32.xlu2 %v2609_v43, %s2671_s19 }
 0x1fc   : > { %v1405_v36 = vld.sshfl [vmem:[#allocation1 + $0x30] sm:$0xff pattern:$0x75316420]  ;;  %v3801_v16 = vpop.permute.xlu2 %1699  ;;  %v1690_v19 = vpop.permute.xlu1 %1689 }
 0x1fd   : > { %2025 = vst [vmem:[#allocation1 + $0x30] ss:$2 sm:$0xff] %v1935_v31  ;;  %2513 = vmatmul.msk.f32.gmra.mxu3 %vm1185_vm3, %v3667_v40  ;;  %v1816_v51 = vpop.permute.xlu0 %1815  ;;  %v1906_v5 = vsel %vm523_vm1, %v2524_v38, %v1690_v19  ;;  %v2610_v40 = vld [vmem:[%s2706_s17 + $0x10a] sm:$0xf]  ;;  %v2531_v31 = vld [vmem:[%s2706_s17 + $0x90] sm:$0xff] }
 0x1fe   : > { %2027 = vst [vmem:[#allocation1 + $0x31] ss:$2 sm:$0xff] %v1997_v22  ;;  %v2030_v54 = vld.sshfl [vmem:[#allocation1 + $0x20] sm:$0xff pattern:$0x75316420]  ;;  %v1937_v17 = vsel %vm556_vm2, %v1905_v3, %v1816_v51  ;;  %v1938_v6 = vsel %vm556_vm2, %v1906_v5, %v3726_v50  ;;  %v2535_v51 = vld [vmem:[%s2706_s17 + $0xb0] sm:$0xff] }
 0x1ff   : > { %2616 = vmatmul.msk.f32.gmra.mxu2 %vm1185_vm3, %v2030_v54  ;;  %v1998_v29 = vrot.slane %v1937_v17, 4  ;;  %2033 = vst [vmem:[#allocation1 + $0x1] ss:$2 sm:$0xff] %v1937_v17 }
 0x200   : > { %2035 = vst [vmem:[#allocation1 + $0x11] ss:$2 sm:$0xff] %v1938_v6 }
 0x201   : > { %2034 = vst [vmem:[#allocation1 + $0x10] ss:$2 sm:$0xff] %v1998_v29  ;;  %2502 = vmatmul.msk.f32.gmra.mxu1 %vm1185_vm3, %v3603_v58 }
 0x202   : > { %1735 = vrot.lane.b32.xlu1 %v2579_v46, %s2670_s18 }
 0x203   : > { %1733 = vrot.lane.b32.xlu0 %v2578_v9, %s2670_s18  ;;  %1861 = vrot.lane.b32.xlu2 %v2610_v40, %s2671_s19 }
 0x204   : > { %v1820_v24 = vpop.permute.xlu1 %1819 }
 0x205   : > { %2514 = vmatmul.msk.f32.gmra.mxu3 %vm1185_vm3, %v3728_v15  ;;  %v2031_v50 = vld.sshfl [vmem:[#allocation1 + $0x30] sm:$0xff pattern:$0x75316420]  ;;  %v1692_v44 = vpop.permute.xlu0 %1691  ;;  %v1704_v42 = vpop.permute.xlu2 %1703  ;;  %v2612_v15 = vld [vmem:[%s2706_s17 + $0x11a] sm:$0xf] }
 0x206   : > { %v1907_v21 = vsel %vm523_vm1, %v2525_v23, %v1692_v44  ;;  %v2040_v41 = vld.sshfl [vmem:[#allocation1] sm:$0xff pattern:$0x75316420]  ;;  %v1913_v53 = vsel %vm523_vm1, %v2531_v31, %v1704_v42  ;;  %v2536_v23 = vld [vmem:[%s2706_s17 + $0xb8] sm:$0xf] }
 0x207   : > { %2617 = vmatmul.msk.f32.gmra.mxu2 %vm1185_vm3, %v2031_v50  ;;  %v1939_v58 = vsel %vm556_vm2, %v1907_v21, %v1820_v24 }
 0x208   : > { %v1999_v61 = vrot.slane %v1939_v58, 4  ;;  %2036 = vst [vmem:[#allocation1 + $0x20] ss:$2 sm:$0xff] %v1939_v58  ;;  %v2041_v56 = vld.sshfl [vmem:[#allocation1 + $0x10] sm:$0xff pattern:$0x75316420] }
 0x209   : > { %2503 = vmatmul.msk.f32.gmra.mxu1 %vm1185_vm3, %v3689_v34 }
 0x20a   : > { %2037 = vst [vmem:[#allocation1 + $0x21] ss:$2 sm:$0xff] %v1999_v61  ;;  %1737 = vrot.lane.b32.xlu1 %v2580_v0, %s2670_s18 }
 0x20b   : > { %1863 = vrot.lane.b32.xlu0 %v2611_v7, %s2671_s19  ;;  %1865 = vrot.lane.b32.xlu2 %v2612_v15, %s2671_s19 }
 0x20c   : > { %v1822_v12 = vpop.permute.xlu1 %1821 }
 0x20d   : > { %2515 = vmatmul.msk.f32.gmra.mxu3 %vm1185_vm3, %v3783_v35  ;;  %v1696_v52 = vpop.permute.xlu0 %1695  ;;  %v1940_v34 = vsel %vm556_vm2, %v1908_v47, %v1822_v12  ;;  %v1712_v49 = vpop.permute.xlu2 %1711 }
 0x20e   : > { %v1909_v1 = vsel %vm523_vm1, %v2527_v4, %v1696_v52  ;;  %2038 = vst [vmem:[#allocation1 + $0x30] ss:$2 sm:$0xff] %v1940_v34  ;;  %v1917_v17 = vsel %vm523_vm1, %v2535_v51, %v1712_v49  ;;  %v2541_v4 = vld [vmem:[%s2706_s17 + $0xe0] sm:$0xff] }
 0x20f   : > { %2618 = vmatmul.msk.f32.gmra.mxu2 %vm1185_vm3, %v2040_v41  ;;  %v1941_v39 = vsel %vm556_vm2, %v1909_v1, %v3781_v59  ;;  %v2537_v41 = vld [vmem:[%s2706_s17 + $0xc0] sm:$0xff] }
 0x210   : > { %v2000_v8 = vrot.slane %v1941_v39, 4  ;;  %2039 = vst [vmem:[#allocation1 + $0x31] ss:$2 sm:$0xff] %v1941_v39 }
 0x211   : > { %2504 = vmatmul.msk.f32.gmra.mxu1 %vm1185_vm3, %v3715_v2  ;;  %v1911_v2 = vsel %vm523_vm1, %v2529_v55, %v3801_v16  ;;  %v2042_v35 = vld.sshfl [vmem:[#allocation1 + $0x20] sm:$0xff pattern:$0x75316420] }
 0x212   : > { %2044 = vst [vmem:[#allocation1] ss:$2 sm:$0xff] %v2000_v8 }
 0x214   : > { %v1826_v28 = vpop.permute.xlu1 %1825 }
 0x215   : > { %2516 = vmatmul.msk.f32.gmra.mxu3 %vm1185_vm3, %v1405_v36  ;;  %v1698_v10 = vpop.permute.xlu0 %1697  ;;  %v1714_v48 = vpop.permute.xlu2 %1713 }
 0x216   : > { %v1910_v18 = vsel %vm523_vm1, %v2528_v13, %v1698_v10  ;;  %v1918_v24 = vsel %vm523_vm1, %v2536_v23, %v1714_v48 }
 0x217   : > { %2619 = vmatmul.msk.f32.gmra.mxu2 %vm1185_vm3, %v2041_v56  ;;  %v1942_v60 = vsel %vm556_vm2, %v1910_v18, %v1826_v28  ;;  %v2043_v38 = vld.sshfl [vmem:[#allocation1 + $0x30] sm:$0xff pattern:$0x75316420]  ;;  %v2538_v56 = vld [vmem:[%s2706_s17 + $0xc8] sm:$0xf] }
 0x218   : > { %2045 = vst [vmem:[#allocation1 + $0x1] ss:$2 sm:$0xff] %v1942_v60 }
 0x219   : > { %2505 = vmatmul.msk.f32.gmra.mxu1 %vm1185_vm3, %v3570_v33  ;;  %v2533_v33 = vld [vmem:[%s2706_s17 + $0xa0] sm:$0xff] }
 0x21c   : > { %v1702_v14 = vpop.permute.xlu1 %1701 }
 0x21d   : > { %v1828_v59 = vpop.permute.xlu0 %1827  ;;  %v1708_v62 = vpop.permute.xlu2 %1707  ;;  %v1912_v43 = vsel %vm523_vm1, %v2530_v20, %v1702_v14 }
 0x21e   : > { %v1943_v63 = vsel %vm556_vm2, %v1911_v2, %v1828_v59  ;;  %v1915_v26 = vsel %vm523_vm1, %v2533_v33, %v1708_v62  ;;  %v2534_v59 = vld [vmem:[%s2706_s17 + $0xa8] sm:$0xf] }
 0x21f   : > { %2620 = vmatmul.msk.f32.gmra.mxu2 %vm1185_vm3, %v2042_v35  ;;  %v2001_v32 = vrot.slane %v1943_v63, 4  ;;  %2046 = vst [vmem:[#allocation1 + $0x10] ss:$2 sm:$0xff] %v1943_v63  ;;  %v2052_v5 = vld.sshfl [vmem:[#allocation1] sm:$0xff pattern:$0x75316420] }
 0x220   : > { %v2543_v35 = vld [vmem:[%s2706_s17 + $0xf0] sm:$0xff] }
 0x221   : > { %2047 = vst [vmem:[#allocation1 + $0x11] ss:$2 sm:$0xff] %v2001_v32  ;;  %2506 = vmatmul.msk.f32.gmra.mxu1 %vm1185_vm3, %v3657_v27 }
 0x224   : > { %v1832_v22 = vpop.permute.xlu1 %1831 }
 0x225   : > { %v1830_v30 = vpop.permute.xlu0 %1829  ;;  %v1945_v36 = vsel %vm556_vm2, %v1913_v53, %v1832_v22  ;;  %v1836_v3 = vpop.permute.xlu2 %1835 }
 0x226   : > { %v1944_v16 = vsel %vm556_vm2, %v1912_v43, %v1830_v30  ;;  %v2002_v27 = vrot.slane %v1945_v36, 4  ;;  %2049 = vst [vmem:[#allocation1 + $0x21] ss:$2 sm:$0xff] %v1945_v36  ;;  %v1947_v19 = vsel %vm556_vm2, %v1915_v26, %v1836_v3  ;;  %v2542_v30 = vld [vmem:[%s2706_s17 + $0xe8] sm:$0xf] }
 0x227   : > { %2621 = vmatmul.msk.f32.gmra.mxu2 %vm1185_vm3, %v2043_v38  ;;  %2048 = vst [vmem:[#allocation1 + $0x20] ss:$2 sm:$0xff] %v1944_v16  ;;  %v2003_v54 = vrot.slane %v1947_v19, 4  ;;  %v1474_v26 = vpop.f32.mrf.mxu1  ;;  %v1255_v38 = vpop.f32.mrf.mxu0  ;;  %v2660_v16 = vld [vmem:[%s2706_s17 + $0xd0] sm:$0xff] }
 0x228   : > { %2050 = vst [vmem:[#allocation1 + $0x30] ss:$2 sm:$0xff] %v2002_v27  ;;  %v2053_v9 = vld.sshfl [vmem:[#allocation1 + $0x10] sm:$0xff pattern:$0x75316420] }
 0x229   : > { %2507 = vmatmul.msk.f32.gmra.mxu1 %vm1185_vm3, %v3722_v45  ;;  %2056 = vst [vmem:[#allocation1] ss:$2 sm:$0xff] %v1947_v19  ;;  %v2532_v45 = vld [vmem:[%s2706_s17 + $0x98] sm:$0xf] }
 0x22a   : > { %2057 = vst [vmem:[#allocation1 + $0x1] ss:$2 sm:$0xff] %v2003_v54 }
 0x22c   : > { %v1706_v6 = vpop.permute.xlu1 %1705 }
 0x22d   : > { %v1840_v29 = vpop.permute.xlu0 %1839  ;;  %v1914_v44 = vsel %vm523_vm1, %v2532_v45, %v1706_v6  ;;  %v1710_v61 = vpop.permute.xlu2 %1709 }
 0x22e   : > { %v1949_v46 = vsel %vm556_vm2, %v1917_v17, %v1840_v29  ;;  %v2054_v50 = vld.sshfl [vmem:[#allocation1 + $0x20] sm:$0xff pattern:$0x75316420]  ;;  %v1916_v32 = vsel %vm523_vm1, %v2534_v59, %v1710_v61 }
 0x22f   : > { %2622 = vmatmul.msk.f32.gmra.mxu2 %vm1185_vm3, %v2052_v5  ;;  %v2004_v40 = vrot.slane %v1949_v46, 4  ;;  %2059 = vst [vmem:[#allocation1 + $0x11] ss:$2 sm:$0xff] %v1949_v46  ;;  %v1258_v45 = vpop.f32.mrf.mxu0 }
 0x231   : > { %2508 = vmatmul.msk.f32.gmra.mxu1 %vm1185_vm3, %v3744_v25  ;;  %2060 = vst [vmem:[#allocation1 + $0x20] ss:$2 sm:$0xff] %v2004_v40  ;;  %v2064_v18 = vld.sshfl [vmem:[#allocation1] sm:$0xff pattern:$0x75316420] }
 0x232   : > { %v3931_v40 = vld [vmem:[%s4072_s2] ss:$0 sm:$0xff] }
 0x234   : > { %v1842_v21 = vpop.permute.xlu1 %1841  ;;  %v3882_v58 = vpop.f32.mrf.mxu3 }
 0x235   : > { %v1834_v42 = vpop.permute.xlu0 %1833  ;;  %v1950_v0 = vsel %vm556_vm2, %v1918_v24, %v1842_v21  ;;  %v1726_v47 = vpop.permute.xlu2 %1725 }
 0x236   : > { %v1946_v57 = vsel %vm556_vm2, %v1914_v44, %v1834_v42  ;;  %2061 = vst [vmem:[#allocation1 + $0x21] ss:$2 sm:$0xff] %v1950_v0  ;;  %v1924_v36 = vsel %vm523_vm1, %v2542_v30, %v1726_v47  ;;  %v1477_v29 = vpop.f32.mrf.mxu1  ;;  %v2548_v30 = vld [vmem:[%s2706_s17 + $0x118] sm:$0xf] }
 0x237   : > { %2623 = vmatmul.msk.f32.gmra.mxu2 %vm1185_vm3, %v2053_v9  ;;  %2051 = vst [vmem:[#allocation1 + $0x31] ss:$2 sm:$0xff] %v1946_v57  ;;  %v1475_v9 = vadd.f32 %v1474_v26, %v1255_v38  ;;  %v2547_v26 = vld [vmem:[%s2706_s17 + $0x110] sm:$0xff] }
 0x239   : > { %2509 = vmatmul.msk.f32.gmra.mxu1 %vm1185_vm3, %v3622_v37 }
 0x23c   : > { %v1724_v25 = vpop.permute.xlu1 %1723  ;;  %v3890_v15 = vpop.f32.mrf.mxu3 }
 0x23d   : > { %v1716_v7 = vpop.permute.xlu0 %1715  ;;  %v1923_v52 = vsel %vm523_vm1, %v2541_v4, %v1724_v25  ;;  %v3898_v49 = vld.sshfl [vmem:[#allocation1 + $0x20] sm:$0xff pattern:$0x75316420]  ;;  %v1846_v10 = vpop.permute.xlu2 %1845 }
 0x23e   : > { %v2055_v12 = vld.sshfl [vmem:[#allocation1 + $0x30] sm:$0xff pattern:$0x75316420]  ;;  %v1919_v34 = vsel %vm523_vm1, %v2537_v41, %v1716_v7 }
 0x23f   : > { %2624 = vmatmul.msk.f32.gmra.mxu2 %vm1185_vm3, %v2054_v50  ;;  %v2540_v50 = vld [vmem:[%s2706_s17 + $0xd8] sm:$0xf] }
 0x241   : > { %2510 = vmatmul.msk.f32.gmra.mxu1 %vm1185_vm3, %v3699_v11 }
 0x244   : > { %v1852_v1 = vpop.permute.xlu1 %1851  ;;  %v3903_v28 = vpop.f32.mrf.mxu3 }
 0x245   : > { %v1844_v37 = vpop.permute.xlu0 %1843  ;;  %v1955_v39 = vsel %vm556_vm2, %v1923_v52, %v1852_v1  ;;  %v1856_v62 = vpop.permute.xlu2 %1855 }
 0x246   : > { %v1951_v8 = vsel %vm556_vm2, %v1919_v34, %v1844_v37  ;;  %v2007_v13 = vrot.slane %v1955_v39, 4  ;;  %2072 = vst [vmem:[#allocation1 + $0x20] ss:$2 sm:$0xff] %v1955_v39  ;;  %v3941_v61 = vpop.f32.mrf.mxu1  ;;  %v1261_v52 = vpop.f32.mrf.mxu0 }
 0x247   : > { %2625 = vmatmul.msk.f32.gmra.mxu2 %vm1185_vm3, %v2055_v12  ;;  %v2005_v11 = vrot.slane %v1951_v8, 4  ;;  %2062 = vst [vmem:[#allocation1 + $0x30] ss:$2 sm:$0xff] %v1951_v8  ;;  %v2544_v12 = vld [vmem:[%s2706_s17 + $0xf8] sm:$0xf] }
 0x248   : > { %2073 = vst [vmem:[#allocation1 + $0x21] ss:$2 sm:$0xff] %v2007_v13 }
 0x249   : > { %2063 = vst [vmem:[#allocation1 + $0x31] ss:$2 sm:$0xff] %v2005_v11 }
 0x24c   : > { %v1720_v48 = vpop.permute.xlu1 %1719  ;;  %v3912_v63 = vpop.f32.mrf.mxu3 }
 0x24d   : > { %v1718_v60 = vpop.permute.xlu0 %1717  ;;  %v1921_v3 = vsel %vm523_vm1, %v2660_v16, %v1720_v48  ;;  %v1850_v6 = vpop.permute.xlu2 %1849 }
 0x24e   : > { %v1920_v55 = vsel %vm523_vm1, %v2538_v56, %v1718_v60  ;;  %v1483_v48 = vpop.f32.mrf.mxu1  ;;  %v1264_v59 = vpop.f32.mrf.mxu0 }
 0x24f   : > { %2626 = vmatmul.msk.f32.gmra.mxu2 %vm1185_vm3, %v2064_v18  ;;  %v1952_v2 = vsel %vm556_vm2, %v1920_v55, %v1846_v10  ;;  %v2078_v14 = vld.sshfl [vmem:[#allocation1 + $0x20] sm:$0xff pattern:$0x75316420]  ;;  %v1478_v18 = vadd.f32 %v1477_v29, %v1258_v45  ;;  %v1481_v29 = vadd.f32 %v3941_v61, %v1261_v52 }
 0x250   : > { %2068 = vst [vmem:[#allocation1] ss:$2 sm:$0xff] %v1952_v2  ;;  %2632 = vmatmul.msk.f32.vlgmr.msra.gmra.mxu3 %vm1185_vm3, %v2078_v14  ;;  %v2067_v43 = vld.sshfl [vmem:[#allocation1 + $0x30] sm:$0xff pattern:$0x75316420] }
 0x251   : > { %v2546_v14 = vld [vmem:[%s2706_s17 + $0x108] sm:$0xf] }
 0x254   : > { %v1838_v31 = vpop.permute.xlu1 %1837  ;;  %v3922_v51 = vpop.f32.mrf.mxu3 }
 0x255   : > { %v1728_v33 = vpop.permute.xlu0 %1727  ;;  %v1948_v20 = vsel %vm556_vm2, %v1916_v32, %v1838_v31  ;;  %v1860_v41 = vpop.permute.xlu2 %1859 }
 0x256   : > { %v1925_v53 = vsel %vm523_vm1, %v2543_v35, %v1728_v33  ;;  %2058 = vst [vmem:[#allocation1 + $0x10] ss:$2 sm:$0xff] %v1948_v20 }
 0x257   : > { %v1957_v22 = vsel %vm556_vm2, %v1925_v53, %v1856_v62 }
 0x258   : > { %2075 = vst [vmem:[#allocation1 + $0x31] ss:$2 sm:$0xff] %v1957_v22  ;;  %v2008_v47 = vrot.slane %v1957_v22, 4 }
 0x25c   : > { %v1854_v27 = vpop.permute.xlu1 %1853  ;;  %v3949_v4 = vpop.f32.mrf.mxu3 }
 0x25d   : > { %v1848_v19 = vpop.permute.xlu0 %1847  ;;  %v1956_v54 = vsel %vm556_vm2, %v1924_v36, %v1854_v27  ;;  %v2065_v17 = vld.sshfl [vmem:[#allocation1 + $0x10] sm:$0xff pattern:$0x75316420]  ;;  %v1862_v55 = vpop.permute.xlu2 %1861 }
 0x25e   : > { %v1953_v5 = vsel %vm556_vm2, %v1921_v3, %v1848_v19  ;;  %2074 = vst [vmem:[#allocation1 + $0x30] ss:$2 sm:$0xff] %v1956_v54  ;;  %2627 = vmatmul.msk.f32.gmra.mxu2 %vm1185_vm3, %v2065_v17  ;;  %v1267_v3 = vpop.f32.mrf.mxu0 }
 0x25f   : > { %v2006_v46 = vrot.slane %v1953_v5, 4  ;;  %2069 = vst [vmem:[#allocation1 + $0x1] ss:$2 sm:$0xff] %v1953_v5 }
 0x261   : > { %2070 = vst [vmem:[#allocation1 + $0x10] ss:$2 sm:$0xff] %v2006_v46 }
 0x263   : > { %v2160_v23 = vpop.f32.mrf.mxu2 }
 0x264   : > { %v2232_v24 = vadd.f32 %v2160_v23, %v1475_v9  ;;  %v1730_v21 = vpop.permute.xlu1 %1729 }
 0x265   : > { %v1722_v44 = vpop.permute.xlu0 %1721  ;;  %v2079_v57 = vld.sshfl [vmem:[#allocation1 + $0x30] sm:$0xff pattern:$0x75316420]  ;;  %v1926_v34 = vsel %vm523_vm1, %v2544_v12, %v1730_v21  ;;  %v1866_v38 = vpop.permute.xlu2 %1865 }
 0x266   : > { %v2260_v42 = vadd.f32 %v3931_v40, %v2232_v24  ;;  %v1922_v0 = vsel %vm523_vm1, %v2540_v50, %v1722_v44  ;;  %2628 = vmatmul.msk.f32.gmra.mxu2 %vm1185_vm3, %v3898_v49  ;;  %2633 = vmatmul.msk.f32.gmra.mxu3 %vm1185_vm3, %v2079_v57  ;;  %v2076_v7 = vld.sshfl [vmem:[#allocation1] sm:$0xff pattern:$0x75316420]  ;;  %v1270_v44 = vpop.f32.mrf.mxu0 }
 0x267   : > { %v1954_v25 = vsel %vm556_vm2, %v1922_v0, %v1850_v6  ;;  %2080 = vst [vmem:[#allocation1] ss:$2 sm:$0xff] %v2008_v47  ;;  %v2661_v49 = vld [vmem:[%s2706_s17 + $0x100] sm:$0xff] }
 0x268   : > { %2285 = vst.msk [vmem:[%s3937_s10] sm:$0xff] %vm2284_vm4, %v2260_v42  ;;  %v1484_v42 = vadd.f32 %v1483_v48, %v1264_v59 }
 0x269   : > { %2071 = vst [vmem:[#allocation1 + $0x11] ss:$2 sm:$0xff] %v1954_v25 }
 0x26c   : > { %v1732_v37 = vpop.permute.xlu1 %1731 }
 0x26d   : > { %v1858_v1 = vpop.permute.xlu0 %1857  ;;  %v1927_v8 = vsel %vm523_vm1, %v2661_v49, %v1732_v37 }
 0x26e   : > { %v1958_v39 = vsel %vm556_vm2, %v1926_v34, %v1858_v1  ;;  %v1959_v13 = vsel %vm556_vm2, %v1927_v8, %v1860_v41  ;;  %2629 = vmatmul.msk.f32.gmra.mxu2 %vm1185_vm3, %v2067_v43  ;;  %v1486_v43 = vpop.f32.mrf.mxu1  ;;  %v1273_v52 = vpop.f32.mrf.mxu0 }
 0x26f   : > { %2081 = vst [vmem:[#allocation1 + $0x1] ss:$2 sm:$0xff] %v1958_v39  ;;  %v2009_v10 = vrot.slane %v1959_v13, 4  ;;  %v1487_v41 = vadd.f32 %v1486_v43, %v1267_v3 }
 0x270   : > { %v3958_v11 = vpop.f32.mrf.mxu3  ;;  %v2077_v56 = vld.sshfl [vmem:[#allocation1 + $0x10] sm:$0xff pattern:$0x75316420] }
 0x271   : > { %2082 = vst [vmem:[#allocation1 + $0x10] ss:$2 sm:$0xff] %v1959_v13 }
 0x272   : > { %v2163_v60 = vpop.f32.mrf.mxu2  ;;  %2083 = vst [vmem:[#allocation1 + $0x11] ss:$2 sm:$0xff] %v2009_v10 }
 0x273   : > { %v2233_v2 = vadd.f32 %v2163_v60, %v1478_v18 }
 0x274   : > { %v1736_v32 = vpop.permute.xlu1 %1735 }
 0x275   : > { %v2261_v35 = vadd.f32 %v3931_v40, %v2233_v2  ;;  %v1734_v62 = vpop.permute.xlu0 %1733  ;;  %v1929_v22 = vsel %vm523_vm1, %v2547_v26, %v1736_v32 }
 0x276   : > { %v1928_v31 = vsel %vm523_vm1, %v2546_v14, %v1734_v62  ;;  %v2088_v33 = vld.sshfl [vmem:[#allocation1] sm:$0xff pattern:$0x75316420]  ;;  %2630 = vmatmul.msk.f32.gmra.mxu2 %vm1185_vm3, %v2076_v7  ;;  %v1489_v50 = vpop.f32.mrf.mxu1 }
 0x277   : > { %2286 = vst.msk [vmem:[%s3937_s10 + $0x8] sm:$0xff] %vm2284_vm4, %v2261_v35  ;;  %v1960_v20 = vsel %vm556_vm2, %v1928_v31, %v1862_v55  ;;  %2634 = vmatmul.msk.f32.gmra.mxu3 %vm1185_vm3, %v2088_v33  ;;  %v1490_v39 = vadd.f32 %v1489_v50, %v1270_v44 }
 0x278   : > { %v3968_v53 = vpop.f32.mrf.mxu3  ;;  %2084 = vst [vmem:[#allocation1 + $0x20] ss:$2 sm:$0xff] %v1960_v20 }
 0x279   : > { %v2089_v54 = vld.sshfl [vmem:[#allocation1 + $0x10] sm:$0xff pattern:$0x75316420] }
 0x27c   : > { %v1738_v16 = vpop.permute.xlu1 %1737 }
 0x27d   : > { %v1864_v36 = vpop.permute.xlu0 %1863  ;;  %v1930_v19 = vsel %vm523_vm1, %v2548_v30, %v1738_v16 }
 0x27e   : > { %v1961_v27 = vsel %vm556_vm2, %v1929_v22, %v1864_v36  ;;  %v1962_v17 = vsel %vm556_vm2, %v1930_v19, %v1866_v38  ;;  %2631 = vmatmul.msk.f32.gmra.mxu2 %vm1185_vm3, %v2077_v56  ;;  %v1492_v7 = vpop.f32.mrf.mxu1  ;;  %v1276_v56 = vpop.f32.mrf.mxu0 }
 0x27f   : > { %v2010_v5 = vrot.slane %v1961_v27, 4  ;;  %2085 = vst [vmem:[#allocation1 + $0x21] ss:$2 sm:$0xff] %v1961_v27  ;;  %2635 = vmatmul.msk.f32.gmra.mxu3 %vm1185_vm3, %v2089_v54  ;;  %v1493_v18 = vadd.f32 %v1492_v7, %v1273_v52 }
 0x280   : > { %v1534_v6 = vpop.f32.mrf.mxu3  ;;  %2087 = vst [vmem:[#allocation1 + $0x31] ss:$2 sm:$0xff] %v1962_v17 }
 0x281   : > { %v3980_v46 = vadd.f32 %v1534_v6, %v3903_v28  ;;  %2086 = vst [vmem:[#allocation1 + $0x30] ss:$2 sm:$0xff] %v2010_v5 }
 0x282   : > { %v2166_v9 = vpop.f32.mrf.mxu2 }
 0x283   : > { %v2234_v23 = vadd.f32 %v2166_v9, %v1481_v29 }
 0x285   : > { %v2262_v45 = vadd.f32 %v3931_v40, %v2234_v23 }
 0x286   : > { %v2090_v24 = vld.sshfl [vmem:[#allocation1 + $0x20] sm:$0xff pattern:$0x75316420]  ;;  %v1495_v49 = vpop.f32.mrf.mxu1  ;;  %v1279_v14 = vpop.f32.mrf.mxu0 }
 0x287   : > { %2287 = vst.msk [vmem:[%s3937_s10 + $0x10] sm:$0xff] %vm2284_vm4, %v2262_v45  ;;  %2636 = vmatmul.msk.f32.gmra.mxu3 %vm1185_vm3, %v2090_v24 }
 0x288   : > { %v1537_v21 = vpop.f32.mrf.mxu3  ;;  %v2091_v25 = vld.sshfl [vmem:[#allocation1 + $0x30] sm:$0xff pattern:$0x75316420] }
 0x289   : > { %v3987_v0 = vadd.f32 %v1537_v21, %v3912_v63 }
 0x28a   : > { %v2169_v28 = vpop.f32.mrf.mxu2 }
 0x28b   : > { %v2235_v57 = vadd.f32 %v2169_v28, %v1484_v42  ;;  %v1529_v42 = vadd.f32 %v3958_v11, %v3882_v58 }
 0x28d   : > { %v2263_v61 = vadd.f32 %v3931_v40, %v2235_v57 }
 0x28e   : > { %v1498_v60 = vpop.f32.mrf.mxu1  ;;  %v1282_v31 = vpop.f32.mrf.mxu0 }
 0x28f   : > { %2288 = vst.msk [vmem:[%s3937_s10 + $0x18] sm:$0xff] %vm2284_vm4, %v2263_v61  ;;  %2637 = vmatmul.msk.f32.gmra.mxu3 %vm1185_vm3, %v2091_v25  ;;  %v1499_v33 = vadd.f32 %v1498_v60, %v1279_v14 }
 0x290   : > { %v1540_v47 = vpop.f32.mrf.mxu3 }
 0x291   : > { %v3994_v12 = vadd.f32 %v1540_v47, %v3922_v51 }
 0x292   : > { %v2172_v34 = vpop.f32.mrf.mxu2 }
 0x293   : > { %v2236_v63 = vadd.f32 %v2172_v34, %v1487_v41 }
 0x295   : > { %v2264_v1 = vadd.f32 %v3931_v40, %v2236_v63 }
 0x296   : > { %v1501_v62 = vpop.f32.mrf.mxu1  ;;  %v1285_v38 = vpop.f32.mrf.mxu0 }
 0x297   : > { %2289 = vst.msk [vmem:[%s3937_s10 + $0x20] sm:$0xff] %vm2284_vm4, %v2264_v1  ;;  %v1502_v30 = vadd.f32 %v1501_v62, %v1282_v31 }
 0x298   : > { %v1543_v37 = vpop.f32.mrf.mxu3 }
 0x299   : > { %v4000_v8 = vadd.f32 %v1543_v37, %v3949_v4  ;;  %v1496_v4 = vadd.f32 %v1495_v49, %v1276_v56  ;;  %v1532_v37 = vadd.f32 %v3968_v53, %v3890_v15 }
 0x29a   : > { %v2175_v13 = vpop.f32.mrf.mxu2 }
 0x29b   : > { %v2237_v10 = vadd.f32 %v2175_v13, %v1490_v39 }
 0x29d   : > { %v2265_v51 = vadd.f32 %v3931_v40, %v2237_v10 }
 0x29e   : > { %v1504_v22 = vpop.f32.mrf.mxu1  ;;  %v1288_v17 = vpop.f32.mrf.mxu0 }
 0x29f   : > { %2290 = vst.msk [vmem:[%s3937_s10 + $0x28] sm:$0xff] %vm2284_vm4, %v2265_v51  ;;  %v1505_v27 = vadd.f32 %v1504_v22, %v1285_v38 }
 0x2a2   : > { %v2178_v48 = vpop.f32.mrf.mxu2 }
 0x2a3   : > { %v2238_v55 = vadd.f32 %v2178_v48, %v1493_v18 }
 0x2a5   : > { %v2266_v2 = vadd.f32 %v3931_v40, %v2238_v55 }
 0x2a6   : > { %v1507_v19 = vpop.f32.mrf.mxu1  ;;  %v1291_v24 = vpop.f32.mrf.mxu0 }
 0x2a7   : > { %2291 = vst.msk [vmem:[%s3937_s10 + $0x30] sm:$0xff] %vm2284_vm4, %v2266_v2  ;;  %v1508_v29 = vadd.f32 %v1507_v19, %v1288_v17 }
 0x2aa   : > { %v2181_v59 = vpop.f32.mrf.mxu2 }
 0x2ab   : > { %v2239_v35 = vadd.f32 %v2181_v59, %v1496_v4 }
 0x2ad   : > { %v2267_v32 = vadd.f32 %v3931_v40, %v2239_v35 }
 0x2ae   : > { %v1510_v23 = vpop.f32.mrf.mxu1  ;;  %v1294_v41 = vpop.f32.mrf.mxu0 }
 0x2af   : > { %2292 = vst.msk [vmem:[%s3937_s10 + $0x38] sm:$0xff] %vm2284_vm4, %v2267_v32  ;;  %v1511_v44 = vadd.f32 %v1510_v23, %v1291_v24 }
 0x2b2   : > { %v2184_v20 = vpop.f32.mrf.mxu2 }
 0x2b3   : > { %v2240_v26 = vadd.f32 %v2184_v20, %v1499_v33 }
 0x2b5   : > { %v2268_v43 = vadd.f32 %v3931_v40, %v2240_v26 }
 0x2b6   : > { %v1513_v61 = vpop.f32.mrf.mxu1  ;;  %v1297_v63 = vpop.f32.mrf.mxu0 }
 0x2b7   : > { %2293 = vst.msk [vmem:[%s3937_s10 + $0x40] sm:$0xff] %vm2284_vm4, %v2268_v43  ;;  %v1514_v34 = vadd.f32 %v1513_v61, %v1294_v41 }
 0x2ba   : > { %v2187_v36 = vpop.f32.mrf.mxu2 }
 0x2bb   : > { %v2241_v16 = vadd.f32 %v2187_v36, %v1502_v30 }
 0x2bd   : > { %v2269_v3 = vadd.f32 %v3931_v40, %v2241_v16 }
 0x2be   : > { %v1516_v52 = vpop.f32.mrf.mxu1  ;;  %v1300_v18 = vpop.f32.mrf.mxu0 }
 0x2bf   : > { %2294 = vst.msk [vmem:[%s3937_s10 + $0x48] sm:$0xff] %vm2284_vm4, %v2269_v3  ;;  %v1517_v39 = vadd.f32 %v1516_v52, %v1297_v63 }
 0x2c2   : > { %v2190_v54 = vpop.f32.mrf.mxu2 }
 0x2c3   : > { %v2242_v5 = vadd.f32 %v2190_v54, %v1505_v27 }
 0x2c5   : > { %v2270_v6 = vadd.f32 %v3931_v40, %v2242_v5 }
 0x2c6   : > { %v1519_v49 = vpop.f32.mrf.mxu1  ;;  %v1303_v4 = vpop.f32.mrf.mxu0 }
 0x2c7   : > { %2295 = vst.msk [vmem:[%s3937_s10 + $0x50] sm:$0xff] %vm2284_vm4, %v2270_v6  ;;  %v1520_v55 = vadd.f32 %v1519_v49, %v1300_v18 }
 0x2ca   : > { %v2193_v9 = vpop.f32.mrf.mxu2 }
 0x2cb   : > { %v2243_v50 = vadd.f32 %v2193_v9, %v1508_v29 }
 0x2cd   : > { %v2271_v45 = vadd.f32 %v3931_v40, %v2243_v50 }
 0x2ce   : > { %v1522_v53 = vpop.f32.mrf.mxu1  ;;  %v1306_v43 = vpop.f32.mrf.mxu0 }
 0x2cf   : > { %2296 = vst.msk [vmem:[%s3937_s10 + $0x58] sm:$0xff] %vm2284_vm4, %v2271_v45  ;;  %v1523_v59 = vadd.f32 %v1522_v53, %v1303_v4 }
 0x2d2   : > { %v2196_v21 = vpop.f32.mrf.mxu2 }
 0x2d3   : > { %v2244_v28 = vadd.f32 %v2196_v21, %v1511_v44  ;;  %v2214_v57 = vpop.f32.mrf.mxu3 }
 0x2d4   : > { %v2250_v7 = vadd.f32 %v2214_v57, %v1529_v42 }
 0x2d5   : > { %v2272_v25 = vadd.f32 %v3931_v40, %v2244_v28 }
 0x2d6   : > { %v2278_v47 = vadd.f32 %v3931_v40, %v2250_v7  ;;  %v1525_v26 = vpop.f32.mrf.mxu1 }
 0x2d7   : > { %2297 = vst.msk [vmem:[%s3937_s10 + $0x60] sm:$0xff] %vm2284_vm4, %v2272_v25  ;;  %v1526_v22 = vadd.f32 %v1525_v26, %v1306_v43 }
 0x2d8   : > { %2303 = vst.msk [vmem:[%s3937_s10 + $0x90] sm:$0xff] %vm2284_vm4, %v2278_v47 }
 0x2e1   : > { %v2199_v58 = vpop.f32.mrf.mxu2 }
 0x2e2   : > { %v2245_v11 = vadd.f32 %v2199_v58, %v1514_v34 }
 0x2e4   : > { %v2273_v1 = vadd.f32 %v3931_v40, %v2245_v11 }
 0x2e6   : > { %2298 = vst.msk [vmem:[%s3937_s10 + $0x68] sm:$0xff] %vm2284_vm4, %v2273_v1 }
 0x2e9   : > { %v2202_v13 = vpop.f32.mrf.mxu2  ;;  %v2217_v10 = vpop.f32.mrf.mxu3 }
 0x2ea   : > { %v2246_v56 = vadd.f32 %v2202_v13, %v1517_v39  ;;  %v2251_v51 = vadd.f32 %v2217_v10, %v1532_v37 }
 0x2ec   : > { %v2274_v48 = vadd.f32 %v3931_v40, %v2246_v56  ;;  %v2279_v60 = vadd.f32 %v3931_v40, %v2251_v51 }
 0x2ee   : > { %2299 = vst.msk [vmem:[%s3937_s10 + $0x70] sm:$0xff] %vm2284_vm4, %v2274_v48 }
 0x2ef   : > { %2304 = vst.msk [vmem:[%s3937_s10 + $0x98] sm:$0xff] %vm2284_vm4, %v2279_v60 }
 0x2f1   : > { %v2205_v2 = vpop.f32.mrf.mxu2 }
 0x2f2   : > { %v2247_v15 = vadd.f32 %v2205_v2, %v1520_v55 }
 0x2f4   : > { %v2275_v14 = vadd.f32 %v3931_v40, %v2247_v15 }
 0x2f6   : > { %2300 = vst.msk [vmem:[%s3937_s10 + $0x78] sm:$0xff] %vm2284_vm4, %v2275_v14 }
 0x2f9   : > { %v2208_v35 = vpop.f32.mrf.mxu2 }
 0x2fa   : > { %v2220_v62 = vpop.f32.mrf.mxu3  ;;  %v2248_v32 = vadd.f32 %v2208_v35, %v1523_v59 }
 0x2fb   : > { %v2252_v31 = vadd.f32 %v2220_v62, %v3980_v46 }
 0x2fc   : > { %v2276_v33 = vadd.f32 %v3931_v40, %v2248_v32 }
 0x2fd   : > { %v2280_v20 = vadd.f32 %v3931_v40, %v2252_v31 }
 0x2fe   : > { %2301 = vst.msk [vmem:[%s3937_s10 + $0x80] sm:$0xff] %vm2284_vm4, %v2276_v33 }
 0x2ff   : > { %2305 = vst.msk [vmem:[%s3937_s10 + $0xa0] sm:$0xff] %vm2284_vm4, %v2280_v20 }
 0x301   : > { %v2211_v30 = vpop.f32.mrf.mxu2 }
 0x302   : > { %v2223_v38 = vpop.f32.mrf.mxu3  ;;  %v2249_v36 = vadd.f32 %v2211_v30, %v1526_v22 }
 0x303   : > { %v2253_v16 = vadd.f32 %v2223_v38, %v3987_v0 }
 0x304   : > { %v2277_v46 = vadd.f32 %v3931_v40, %v2249_v36 }
 0x305   : > { %v2281_v3 = vadd.f32 %v3931_v40, %v2253_v16 }
 0x306   : > { %2302 = vst.msk [vmem:[%s3937_s10 + $0x88] sm:$0xff] %vm2284_vm4, %v2277_v46 }
 0x307   : > { %2306 = vst.msk [vmem:[%s3937_s10 + $0xa8] sm:$0xff] %vm2284_vm4, %v2281_v3 }
 0x30a   : > { %v2226_v27 = vpop.f32.mrf.mxu3 }
 0x30b   : > { %v2254_v19 = vadd.f32 %v2226_v27, %v3994_v12 }
 0x30d   : > { %v2282_v54 = vadd.f32 %v3931_v40, %v2254_v19 }
 0x30f   : > { %2307 = vst.msk [vmem:[%s3937_s10 + $0xb0] sm:$0xff] %vm2284_vm4, %v2282_v54 }
 0x312   : > { %v2229_v5 = vpop.f32.mrf.mxu3 }
 0x313   : > { %v2255_v17 = vadd.f32 %v2229_v5, %v4000_v8 }
 0x315   : > { %v2283_v0 = vadd.f32 %v3931_v40, %v2255_v17 }
 0x317   : > { %2308 = vst.msk [vmem:[%s3937_s10 + $0xb8] sm:$0xff] %vm2284_vm4, %v2283_v0 }
 0x318 PF: > { %s13_s12 = sadd.s32 1, %s2668_s12  }
 0x319   : > { %p10_p4 = scmp.ge.s32.totalorder %s13_s12, 4  }
 0x31b   :  { %12 = sbr.rel (!%p10_p4) target bundleno = 1 (0x1), region = 85 }

</bundles_post_ra>
